<compile_context>
chip_gen: v6e
topology: v6e:2x2x1
jax: 0.10.0
libtpu: 0.0.40
codegen_flags: <defaults>
</compile_context>

<pallas_src>
import functools

import jax
import jax.numpy as jnp
from jax.experimental import pallas as pl
from jax.experimental.pallas import tpu as pltpu

K_NEIGHBORS = 16  # self.k in the PyTorch module
_NEG_INF = float("-inf")


def _const_spec(shape):
    nd = len(shape)
    return pl.BlockSpec(shape, lambda b, i: (0,) * nd)


def _mosaic_params(semantics, working_set_bytes):
    kwargs = {"dimension_semantics": semantics}
    if working_set_bytes > 24 * 1024 * 1024:
        # Raise the scoped VMEM limit, staying under v7x's 64 MiB physical VMEM.
        kwargs["vmem_limit_bytes"] = int(min(2 * working_set_bytes, 56 * 1024 * 1024))
    return pltpu.CompilerParams(**kwargs)


def _pick_tile(n):
    if n <= 256:
        return n
    if n >= 8192:
        return 128  # keep Kernel A's (TN, N) working set comfortable on v7x (64 MiB VMEM)
    return 256


# ---------------------------------------------------------------------------
# Kernel A: kNN (packed-key streaming top-k) + local_cov + mlp1 + per-tile max(lf1)
# ---------------------------------------------------------------------------
def _knn_cov_mlp1_kernel(pts_ref, sqa_ref,
                         w1p_ref, w1o_ref, b1_ref, w2_ref, b2_ref, w3_ref, b3_ref,
                         idx_ref, lf1_ref, gmax1_ref, *, n, tn, k):
    i = pl.program_id(1)
    p_all = pts_ref[0]                                            # (N, 3)  f32 resident
    row0 = pl.multiple_of(i * tn, tn)
    p_t = pts_ref[0, pl.ds(row0, tn), :]                          # (TN, 3) f32 row tile
    sqa = sqa_ref[0]                                              # (1, N)  f32 (hoisted)

    # --- pairwise squared distance for this row tile: (TN, N) f32 ---
    gram = jax.lax.dot_general(p_t, p_all, (((1,), (1,)), ((), ())),
                               preferred_element_type=jnp.float32)
    sq_t = jnp.sum(p_t * p_t, axis=-1, keepdims=True)             # (TN, 1)
    d2 = jnp.maximum(sq_t + sqa - 2.0 * gram, 0.0)                # (TN, N), >= 0

    # --- packed-key streaming top-k: one cross-lane max per selection ---
    ib = max((n - 1).bit_length(), 4)                             # index bits
    imask = (1 << ib) - 1
    qmax = (1 << (31 - ib)) - 1
    col = jax.lax.broadcasted_iota(jnp.int32, (tn, n), 1)
    colk = jax.lax.broadcasted_iota(jnp.int32, (tn, k), 1)
    # d2 >= 0 so its f32 bit pattern is monotone in d2; drop low mantissa bits so the
    # quantized (negated) distance and the inverted column index share one int32 key.
    q = pltpu.bitcast(d2, jnp.int32) >> (ib + 1)
    key = ((qmax - q) << ib) | (imask - col)                      # max -> nearest, then
                                                                  # smallest index on ties

    def select_one(j, carry):
        key_c, idx_acc = carry
        mk = jnp.max(key_c, axis=-1, keepdims=True)               # (TN, 1) int32 lane max
        sel = imask - (mk & imask)                                # selected column
        idx_acc = jnp.where(colk == j, sel, idx_acc)
        key_c = jnp.where(col == sel, -1, key_c)                  # mask selected column
        return key_c, idx_acc

    _, idx_acc = jax.lax.fori_loop(
        0, k, select_one, (key, jnp.zeros((tn, k), jnp.int32)))

    # --- neighbor-1 coordinates (topk position 1) via one-hot gather (tiny matmul) ---
    oh1 = jnp.where(col == idx_acc[:, 1:2], 1.0, 0.0)
    p1 = jnp.dot(oh1, p_all, preferred_element_type=jnp.float32)  # (TN, 3)

    # --- local_cov + mlp1; first conv decomposed so outer(p0, p1) is never built ---
    # (topk position 0 is the query point itself -> p0 coords == p_t)
    h = jnp.dot(p_t, w1p_ref[...], preferred_element_type=jnp.float32)
    for a in range(3):
        h = h + p_t[:, a:a + 1] * jnp.dot(p1, w1o_ref[a],
                                          preferred_element_type=jnp.float32)
    h = jnp.maximum(h + b1_ref[...], 0.0)
    h = jnp.maximum(jnp.dot(h.astype(jnp.bfloat16), w2_ref[...],
                            preferred_element_type=jnp.float32) + b2_ref[...], 0.0)
    h = jnp.maximum(jnp.dot(h.astype(jnp.bfloat16), w3_ref[...],
                            preferred_element_type=jnp.float32) + b3_ref[...], 0.0)

    idx_ref[0] = idx_acc
    lf1_ref[0] = h.astype(jnp.bfloat16)
    gmax1_ref[0, 0] = jnp.max(h, axis=0, keepdims=True)           # per-tile partial max


def knn_cov_mlp1(pts, sq, params, *, tn, k=K_NEIGHBORS):
    B, N, _ = pts.shape
    nt = N // tn
    w1p, w1o, b1 = params["mlp1_1"]
    w2, b2 = params["mlp1_2"]
    w3, b3 = params["mlp1_3"]
    kernel = functools.partial(_knn_cov_mlp1_kernel, n=N, tn=tn, k=k)
    est = 10 * tn * N * 4 + 2 * N * 128 * 4
    return pl.pallas_call(
        kernel,
        out_shape=(
            jax.ShapeDtypeStruct((B, N, k), jnp.int32),
            jax.ShapeDtypeStruct((B, N, 64), jnp.bfloat16),
            jax.ShapeDtypeStruct((nt, B, 1, 64), jnp.float32),
        ),
        grid=(B, nt),
        in_specs=[
            pl.BlockSpec((1, N, 3), lambda b, i: (b, 0, 0)),
            pl.BlockSpec((1, 1, N), lambda b, i: (b, 0, 0)),
            _const_spec(w1p.shape), _const_spec(w1o.shape), _const_spec(b1.shape),
            _const_spec(w2.shape), _const_spec(b2.shape),
            _const_spec(w3.shape), _const_spec(b3.shape),
        ],
        out_specs=(
            pl.BlockSpec((1, tn, k), lambda b, i: (b, i, 0)),
            pl.BlockSpec((1, tn, 64), lambda b, i: (b, i, 0)),
            pl.BlockSpec((1, 1, 1, 64), lambda b, i: (i, b, 0, 0)),
        ),
        compiler_params=_mosaic_params(("parallel", "parallel"), est),
    )(pts, sq, w1p, w1o, b1, w2, b2, w3, b3)


# ---------------------------------------------------------------------------
# Shared in-kernel helper: neighbor gather + local max-pool
# (exact one-hot MXU matmuls; fori_loop keeps a single (TN, N) one-hot live)
# ---------------------------------------------------------------------------
def _gather_maxpool(idx, feat, *, n, tn, k):
    col = jax.lax.broadcasted_iota(jnp.int32, (tn, n), 1)
    colk = jax.lax.broadcasted_iota(jnp.int32, (tn, k), 1)

    def body(j, acc):
        sel_j = jnp.sum(jnp.where(colk == j, idx, 0), axis=-1, keepdims=True)  # (TN, 1)
        oh = jnp.where(col == sel_j, 1.0, 0.0).astype(jnp.bfloat16)
        g = jnp.dot(oh, feat, preferred_element_type=jnp.float32)
        return jnp.maximum(acc, g)

    init = jnp.full((tn, feat.shape[-1]), _NEG_INF, jnp.float32)
    return jax.lax.fori_loop(0, k, body, init)


# ---------------------------------------------------------------------------
# Kernel B: graph stage 1 = gather/max-pool + linear1 + relu(conv1)
# ---------------------------------------------------------------------------
def _graph_stage1_kernel(idx_ref, lf1_ref, wl_ref, bl_ref, wc_ref, bc_ref, h_ref,
                         *, n, tn, k):
    pooled = _gather_maxpool(idx_ref[0], lf1_ref[0], n=n, tn=tn, k=k)
    t = jnp.dot(pooled.astype(jnp.bfloat16), wl_ref[...],
                preferred_element_type=jnp.float32) + bl_ref[...]      # linear1
    t = jnp.dot(t.astype(jnp.bfloat16), wc_ref[...],
                preferred_element_type=jnp.float32) + bc_ref[...]      # conv1
    h_ref[0] = jnp.maximum(t, 0.0).astype(jnp.bfloat16)                # ReLU


def graph_stage1(nbr_idx, lf1, params, *, tn, k=K_NEIGHBORS):
    B, N, C = lf1.shape
    wl, bl = params["linear1"]
    wc, bc = params["conv1"]
    Cout = wc.shape[1]
    kernel = functools.partial(_graph_stage1_kernel, n=N, tn=tn, k=k)
    est = 3 * tn * N * 4 + 2 * N * C * 2
    return pl.pallas_call(
        kernel,
        out_shape=jax.ShapeDtypeStruct((B, N, Cout), jnp.bfloat16),
        grid=(B, N // tn),
        in_specs=[
            pl.BlockSpec((1, tn, k), lambda b, i: (b, i, 0)),
            pl.BlockSpec((1, N, C), lambda b, i: (b, 0, 0)),
            _const_spec(wl.shape), _const_spec(bl.shape),
            _const_spec(wc.shape), _const_spec(bc.shape),
        ],
        out_specs=pl.BlockSpec((1, tn, Cout), lambda b, i: (b, i, 0)),
        compiler_params=_mosaic_params(("parallel", "parallel"), est),
    )(nbr_idx, lf1, wl, bl, wc, bc)


# ---------------------------------------------------------------------------
# Kernel C: graph stage 2 = gather/max-pool + linear2 + conv2 + per-tile max
#           (local_feat_2 never touches HBM)
# ---------------------------------------------------------------------------
def _graph_stage2_kernel(idx_ref, h_ref, wl_ref, bl_ref, wc_ref, bc_ref, gmax_ref,
                         *, n, tn, k):
    pooled = _gather_maxpool(idx_ref[0], h_ref[0], n=n, tn=tn, k=k)
    t = jnp.dot(pooled.astype(jnp.bfloat16), wl_ref[...],
                preferred_element_type=jnp.float32) + bl_ref[...]      # linear2
    lf2 = jnp.dot(t.astype(jnp.bfloat16), wc_ref[...],
                  preferred_element_type=jnp.float32) + bc_ref[...]    # conv2 (no relu)
    gmax_ref[0, 0] = jnp.max(lf2, axis=0, keepdims=True)               # (1, 1024)


def graph_stage2(nbr_idx, h, params, *, tn, k=K_NEIGHBORS):
    B, N, C = h.shape
    nt = N // tn
    wl, bl = params["linear2"]
    wc, bc = params["conv2"]
    Cout = wc.shape[1]
    kernel = functools.partial(_graph_stage2_kernel, n=N, tn=tn, k=k)
    est = 3 * tn * N * 4 + 2 * N * C * 2 + tn * Cout * 4
    return pl.pallas_call(
        kernel,
        out_shape=jax.ShapeDtypeStruct((nt, B, 1, Cout), jnp.float32),
        grid=(B, nt),
        in_specs=[
            pl.BlockSpec((1, tn, k), lambda b, i: (b, i, 0)),
            pl.BlockSpec((1, N, C), lambda b, i: (b, 0, 0)),
            _const_spec(wl.shape), _const_spec(bl.shape),
            _const_spec(wc.shape), _const_spec(bc.shape),
        ],
        out_specs=pl.BlockSpec((1, 1, 1, Cout), lambda b, i: (i, b, 0, 0)),
        compiler_params=_mosaic_params(("parallel", "parallel"), est),
    )(nbr_idx, h, wl, bl, wc, bc)


# ---------------------------------------------------------------------------
# Head: fc_mu (and fc_var if not AE) on the 1088-wide global max (tiny matmuls)
# ---------------------------------------------------------------------------
def _head_kernel(g1_ref, g2_ref, *refs, n_heads):
    g1 = g1_ref[...]
    g2 = g2_ref[...]
    for hi in range(n_heads):
        w1, w2, b = refs[3 * hi], refs[3 * hi + 1], refs[3 * hi + 2]
        out = refs[3 * n_heads + hi]
        out[...] = (jnp.dot(g1, w1[...], preferred_element_type=jnp.float32)
                    + jnp.dot(g2, w2[...], preferred_element_type=jnp.float32)
                    + b[...])


def head(g1, g2, params, *, modeltype):
    B = g1.shape[0]
    wm1, wm2, bm = params["fc_mu"]
    fd = wm1.shape[1]
    if modeltype == "AE":
        kernel = functools.partial(_head_kernel, n_heads=1)
        out_shape = (jax.ShapeDtypeStruct((B, fd), jnp.float32),)
        args = (g1, g2, wm1, wm2, bm)
    else:
        wv1, wv2, bv = params["fc_var"]
        kernel = functools.partial(_head_kernel, n_heads=2)
        out_shape = (jax.ShapeDtypeStruct((B, fd), jnp.float32),
                     jax.ShapeDtypeStruct((B, fd), jnp.float32))
        args = (g1, g2, wm1, wm2, bm, wv1, wv2, bv)
    return pl.pallas_call(kernel, out_shape=out_shape)(*args)


# ---------------------------------------------------------------------------
# Parameters (deterministic, synthetic — shapes follow the module __init__)
# ---------------------------------------------------------------------------
def init_params(feat_dims, key):
    def dense(kk, cin, cout, dtype=jnp.float32, scale=0.05):
        kw, kb = jax.random.split(kk)
        w = (jax.random.normal(kw, (cin, cout), jnp.float32) * scale).astype(dtype)
        b = jax.random.normal(kb, (1, cout), jnp.float32) * scale
        return w, b

    ks = jax.random.split(key, 9)
    w1, b1 = dense(ks[0], 12, 64)
    w_mu, b_mu = dense(ks[7], 64 + 1024, feat_dims)
    w_var, b_var = dense(ks[8], 64 + 1024, feat_dims)
    return {
        # mlp1 first conv, split for the fused local_cov: rows 0:3 hit the raw
        # points; rows 3:12 hit the 3x3 outer product (host-reshaped to (3,3,64)).
        "mlp1_1": (w1[0:3], w1[3:12].reshape(3, 3, 64), b1),
        "mlp1_2": dense(ks[1], 64, 64, jnp.bfloat16),
        "mlp1_3": dense(ks[2], 64, 64, jnp.bfloat16),
        "linear1": dense(ks[3], 64, 64, jnp.bfloat16),
        "conv1": dense(ks[4], 64, 128, jnp.bfloat16),
        "linear2": dense(ks[5], 128, 128, jnp.bfloat16),
        "conv2": dense(ks[6], 128, 1024, jnp.bfloat16),
        # fc_mu / fc_var weights split to match cat([local_feat_1, local_feat_2]).
        "fc_mu": (w_mu[:64], w_mu[64:], b_mu),
        "fc_var": (w_var[:64], w_var[64:], b_var),
    }


# ---------------------------------------------------------------------------
# Forward
# ---------------------------------------------------------------------------
def skip_variational_encoder(pts, params, *, modeltype="VAE", k=K_NEIGHBORS):
    # pts: (B, n_points, 3) — same input convention as the PyTorch module.
    B, N, _ = pts.shape
    assert N % 8 == 0 and N >= k
    tn = _pick_tile(N)
    assert N % tn == 0
    pts = pts.astype(jnp.float32)
    sq = jnp.sum(pts * pts, axis=-1)[:, None, :]                  # (B, 1, N), hoisted

    nbr_idx, lf1, gmax1 = knn_cov_mlp1(pts, sq, params, tn=tn, k=k)
    h = graph_stage1(nbr_idx, lf1, params, tn=tn, k=k)            # (B, N, 128) bf16
    gmax2 = graph_stage2(nbr_idx, h, params, tn=tn, k=k)          # (nt, B, 1, 1024)

    g1 = jnp.max(gmax1, axis=0).reshape(B, 64)                    # cross-tile reduce
    g2 = jnp.max(gmax2, axis=0).reshape(B, 1024)
    outs = head(g1, g2, params, modeltype=modeltype)
    if modeltype == "AE":
        return outs[0][..., None]                                  # (B, feat_dims, 1)
    mu, sigma = outs
    return mu[..., None], sigma[..., None]                         # each (B, feat_dims, 1)


if __name__ == "__main__":
    B, N, FEAT_DIMS = 2, 64, 32
    key = jax.random.PRNGKey(0)
    kp, kx = jax.random.split(key)
    params = init_params(FEAT_DIMS, kp)
    pts = jax.random.normal(kx, (B, N, 3), jnp.float32)

    mu, sigma = skip_variational_encoder(pts, params, modeltype="VAE")
    mu, sigma = jax.block_until_ready((mu, sigma))
    assert mu.shape == (B, FEAT_DIMS, 1), mu.shape
    assert sigma.shape == (B, FEAT_DIMS, 1), sigma.shape
    assert bool(jnp.all(jnp.isfinite(mu))) and bool(jnp.all(jnp.isfinite(sigma)))
    print("KERNEL_OK")
</pallas_src>

<mosaic_0001>
module attributes {stable_mosaic.version = 11 : i64} {
  func.func @_knn_cov_mlp1_kernel(%arg0: i32, %arg1: i32, %arg2: memref<1x64x3xf32, #tpu.memory_space<vmem>>, %arg3: memref<1x1x64xf32, #tpu.memory_space<vmem>>, %arg4: memref<3x64xf32, #tpu.memory_space<vmem>>, %arg5: memref<3x3x64xf32, #tpu.memory_space<vmem>>, %arg6: memref<1x64xf32, #tpu.memory_space<vmem>>, %arg7: memref<64x64xbf16, #tpu.memory_space<vmem>>, %arg8: memref<1x64xf32, #tpu.memory_space<vmem>>, %arg9: memref<64x64xbf16, #tpu.memory_space<vmem>>, %arg10: memref<1x64xf32, #tpu.memory_space<vmem>>, %arg11: memref<1x64x16xi32, #tpu.memory_space<vmem>>, %arg12: memref<1x64x64xbf16, #tpu.memory_space<vmem>>, %arg13: memref<1x1x1x64xf32, #tpu.memory_space<vmem>>) attributes {dimension_semantics = [#tpu.dimension_semantics<parallel>, #tpu.dimension_semantics<parallel>], iteration_bounds = array<i64: 2, 1>, scalar_prefetch = 0 : i64, scratch_operands = 0 : i64, tpu.core_type = #tpu.core_type<tc>, window_params = [{transform_indices = @transform_0, window_bounds = array<i64: 1, 64, 3>}, {transform_indices = @transform_1, window_bounds = array<i64: 1, 1, 64>}, {pipeline_mode = #tpu.pipeline_mode<synchronous>, transform_indices = @transform_2, window_bounds = array<i64: 3, 64>}, {pipeline_mode = #tpu.pipeline_mode<synchronous>, transform_indices = @transform_3, window_bounds = array<i64: 3, 3, 64>}, {pipeline_mode = #tpu.pipeline_mode<synchronous>, transform_indices = @transform_4, window_bounds = array<i64: 1, 64>}, {pipeline_mode = #tpu.pipeline_mode<synchronous>, transform_indices = @transform_5, window_bounds = array<i64: 64, 64>}, {pipeline_mode = #tpu.pipeline_mode<synchronous>, transform_indices = @transform_6, window_bounds = array<i64: 1, 64>}, {pipeline_mode = #tpu.pipeline_mode<synchronous>, transform_indices = @transform_7, window_bounds = array<i64: 64, 64>}, {pipeline_mode = #tpu.pipeline_mode<synchronous>, transform_indices = @transform_8, window_bounds = array<i64: 1, 64>}, {transform_indices = @transform_9, window_bounds = array<i64: 1, 64, 16>}, {transform_indices = @transform_10, window_bounds = array<i64: 1, 64, 64>}, {transform_indices = @transform_11, window_bounds = array<i64: 1, 1, 1, 64>}]} {
    %c0 = arith.constant 0 : index
    %c0_0 = arith.constant 0 : index
    %c0_1 = arith.constant 0 : index
    %0 = vector.load %arg2[%c0, %c0_0, %c0_1] : memref<1x64x3xf32, #tpu.memory_space<vmem>>, vector<1x64x3xf32>
    %1 = vector.shape_cast %0 : vector<1x64x3xf32> to vector<64x3xf32>
    %c64_i32 = arith.constant 64 : i32
    %2 = arith.muli %arg1, %c64_i32 : i32
    %3 = tpu.assume_multiple %2, 64 : i32
    %c0_2 = arith.constant 0 : index
    %4 = arith.index_cast %3 : i32 to index
    %c0_3 = arith.constant 0 : index
    %5 = vector.load %arg2[%c0_2, %4, %c0_3] : memref<1x64x3xf32, #tpu.memory_space<vmem>>, vector<1x64x3xf32>
    %6 = vector.shape_cast %5 : vector<1x64x3xf32> to vector<64x3xf32>
    %c0_4 = arith.constant 0 : index
    %c0_5 = arith.constant 0 : index
    %c0_6 = arith.constant 0 : index
    %7 = vector.load %arg3[%c0_4, %c0_5, %c0_6] : memref<1x1x64xf32, #tpu.memory_space<vmem>>, vector<1x1x64xf32>
    %8 = vector.shape_cast %7 : vector<1x1x64xf32> to vector<1x64xf32>
    %cst = arith.constant dense<0.000000e+00> : vector<64x64xf32>
    %9 = tpu.matmul %6, %1, %cst {dimension_numbers = #tpu.dot_dimension_numbers<[1], [1], [0], [0], [0, 0, 1, 0], [], []>} : vector<64x3xf32>, vector<64x3xf32>, vector<64x64xf32> -> vector<64x64xf32>
    %10 = arith.mulf %6, %6 : vector<64x3xf32>
    %cst_7 = arith.constant dense<0.000000e+00> : vector<64xf32>
    %11 = vector.multi_reduction <add>, %10, %cst_7 [1] : vector<64x3xf32> to vector<64xf32>
    %12 = vector.shape_cast %11 : vector<64xf32> to vector<64x1xf32>
    %13 = vector.broadcast %12 : vector<64x1xf32> to vector<64x64xf32>
    %14 = vector.broadcast %8 : vector<1x64xf32> to vector<64x64xf32>
    %15 = arith.addf %13, %14 : vector<64x64xf32>
    %cst_8 = arith.constant 2.000000e+00 : f32
    %16 = vector.broadcast %cst_8 : f32 to vector<64x64xf32>
    %17 = arith.mulf %16, %9 : vector<64x64xf32>
    %18 = arith.subf %15, %17 : vector<64x64xf32>
    %cst_9 = arith.constant 0.000000e+00 : f32
    %19 = vector.broadcast %cst_9 : f32 to vector<64x64xf32>
    %20 = arith.maximumf %18, %19 : vector<64x64xf32>
    %21 = tpu.iota {dimensions = array<i32: 1>} : vector<64x64xi32>
    %22 = tpu.iota {dimensions = array<i32: 1>} : vector<64x16xi32>
    %23 = tpu.bitcast %20 : vector<64x64xf32> -> vector<64x64xi32>
    %c7_i32 = arith.constant 7 : i32
    %24 = vector.broadcast %c7_i32 : i32 to vector<64x64xi32>
    %25 = arith.shrsi %23, %24 : vector<64x64xi32>
    %c33554431_i32 = arith.constant 33554431 : i32
    %26 = vector.broadcast %c33554431_i32 : i32 to vector<64x64xi32>
    %27 = arith.subi %26, %25 : vector<64x64xi32>
    %c6_i32 = arith.constant 6 : i32
    %28 = vector.broadcast %c6_i32 : i32 to vector<64x64xi32>
    %29 = arith.shli %27, %28 : vector<64x64xi32>
    %c63_i32 = arith.constant 63 : i32
    %30 = vector.broadcast %c63_i32 : i32 to vector<64x64xi32>
    %31 = arith.subi %30, %21 : vector<64x64xi32>
    %32 = arith.ori %29, %31 : vector<64x64xi32>
    %c0_i32 = arith.constant 0 : i32
    %33 = vector.broadcast %c0_i32 : i32 to vector<64x16xi32>
    %c0_i32_10 = arith.constant 0 : i32
    %c16_i32 = arith.constant 16 : i32
    %34 = arith.addi %c0_i32_10, %c16_i32 : i32
    %c1_i32 = arith.constant 1 : i32
    %35:2 = scf.for %arg14 = %c0_i32_10 to %34 step %c1_i32 iter_args(%arg15 = %32, %arg16 = %33) -> (vector<64x64xi32>, vector<64x16xi32>)  : i32 {
      %cst_54 = arith.constant dense<-2147483648> : vector<64xi32>
      %99 = vector.multi_reduction <maxsi>, %arg15, %cst_54 [1] : vector<64x64xi32> to vector<64xi32>
      %100 = vector.shape_cast %99 : vector<64xi32> to vector<64x1xi32>
      %c63_i32_55 = arith.constant 63 : i32
      %101 = vector.broadcast %c63_i32_55 : i32 to vector<64x1xi32>
      %102 = arith.andi %100, %101 : vector<64x1xi32>
      %c63_i32_56 = arith.constant 63 : i32
      %103 = vector.broadcast %c63_i32_56 : i32 to vector<64x1xi32>
      %104 = arith.subi %103, %102 : vector<64x1xi32>
      %105 = vector.broadcast %arg14 : i32 to vector<64x16xi32>
      %106 = arith.cmpi eq, %22, %105 : vector<64x16xi32>
      %107 = vector.shape_cast %104 : vector<64x1xi32> to vector<64x1xi32>
      %108 = vector.broadcast %107 : vector<64x1xi32> to vector<64x16xi32>
      %109 = arith.select %106, %108, %arg16 : vector<64x16xi1>, vector<64x16xi32>
      %110 = vector.broadcast %104 : vector<64x1xi32> to vector<64x64xi32>
      %111 = arith.cmpi eq, %21, %110 : vector<64x64xi32>
      %c-1_i32 = arith.constant -1 : i32
      %112 = vector.broadcast %c-1_i32 : i32 to vector<64x64xi32>
      %113 = arith.select %111, %112, %arg15 : vector<64x64xi1>, vector<64x64xi32>
      scf.yield %113, %109 : vector<64x64xi32>, vector<64x16xi32>
    }
    %c16_i32_11 = arith.constant 16 : i32
    %36 = vector.extract_strided_slice %35#1 {offsets = [0, 1], sizes = [64, 1], strides = [1, 1]} : vector<64x16xi32> to vector<64x1xi32>
    %37 = vector.broadcast %36 : vector<64x1xi32> to vector<64x64xi32>
    %38 = arith.cmpi eq, %21, %37 : vector<64x64xi32>
    %cst_12 = arith.constant 1.000000e+00 : f32
    %cst_13 = arith.constant 0.000000e+00 : f32
    %39 = vector.broadcast %cst_12 : f32 to vector<64x64xf32>
    %40 = vector.broadcast %cst_13 : f32 to vector<64x64xf32>
    %41 = arith.select %38, %39, %40 : vector<64x64xi1>, vector<64x64xf32>
    %cst_14 = arith.constant dense<0.000000e+00> : vector<64x3xf32>
    %42 = tpu.matmul %41, %1, %cst_14 {dimension_numbers = #tpu.dot_dimension_numbers<[1], [0], [0], [1], [0, 0, 1, 1], [], []>} : vector<64x64xf32>, vector<64x3xf32>, vector<64x3xf32> -> vector<64x3xf32>
    %c0_15 = arith.constant 0 : index
    %c0_16 = arith.constant 0 : index
    %43 = vector.load %arg4[%c0_15, %c0_16] : memref<3x64xf32, #tpu.memory_space<vmem>>, vector<3x64xf32>
    %cst_17 = arith.constant dense<0.000000e+00> : vector<64x64xf32>
    %44 = tpu.matmul %6, %43, %cst_17 {dimension_numbers = #tpu.dot_dimension_numbers<[1], [0], [0], [1], [0, 0, 1, 1], [], []>} : vector<64x3xf32>, vector<3x64xf32>, vector<64x64xf32> -> vector<64x64xf32>
    %45 = vector.extract_strided_slice %6 {offsets = [0, 0], sizes = [64, 1], strides = [1, 1]} : vector<64x3xf32> to vector<64x1xf32>
    %c0_18 = arith.constant 0 : index
    %c0_19 = arith.constant 0 : index
    %c0_20 = arith.constant 0 : index
    %46 = vector.load %arg5[%c0_18, %c0_19, %c0_20] : memref<3x3x64xf32, #tpu.memory_space<vmem>>, vector<1x3x64xf32>
    %47 = vector.shape_cast %46 : vector<1x3x64xf32> to vector<3x64xf32>
    %cst_21 = arith.constant dense<0.000000e+00> : vector<64x64xf32>
    %48 = tpu.matmul %42, %47, %cst_21 {dimension_numbers = #tpu.dot_dimension_numbers<[1], [0], [0], [1], [0, 0, 1, 1], [], []>} : vector<64x3xf32>, vector<3x64xf32>, vector<64x64xf32> -> vector<64x64xf32>
    %49 = vector.broadcast %45 : vector<64x1xf32> to vector<64x64xf32>
    %50 = arith.mulf %49, %48 : vector<64x64xf32>
    %51 = arith.addf %44, %50 : vector<64x64xf32>
    %52 = vector.extract_strided_slice %6 {offsets = [0, 1], sizes = [64, 1], strides = [1, 1]} : vector<64x3xf32> to vector<64x1xf32>
    %c1 = arith.constant 1 : index
    %c0_22 = arith.constant 0 : index
    %c0_23 = arith.constant 0 : index
    %53 = vector.load %arg5[%c1, %c0_22, %c0_23] : memref<3x3x64xf32, #tpu.memory_space<vmem>>, vector<1x3x64xf32>
    %54 = vector.shape_cast %53 : vector<1x3x64xf32> to vector<3x64xf32>
    %cst_24 = arith.constant dense<0.000000e+00> : vector<64x64xf32>
    %55 = tpu.matmul %42, %54, %cst_24 {dimension_numbers = #tpu.dot_dimension_numbers<[1], [0], [0], [1], [0, 0, 1, 1], [], []>} : vector<64x3xf32>, vector<3x64xf32>, vector<64x64xf32> -> vector<64x64xf32>
    %56 = vector.broadcast %52 : vector<64x1xf32> to vector<64x64xf32>
    %57 = arith.mulf %56, %55 : vector<64x64xf32>
    %58 = arith.addf %51, %57 : vector<64x64xf32>
    %59 = vector.extract_strided_slice %6 {offsets = [0, 2], sizes = [64, 1], strides = [1, 1]} : vector<64x3xf32> to vector<64x1xf32>
    %c2 = arith.constant 2 : index
    %c0_25 = arith.constant 0 : index
    %c0_26 = arith.constant 0 : index
    %60 = vector.load %arg5[%c2, %c0_25, %c0_26] : memref<3x3x64xf32, #tpu.memory_space<vmem>>, vector<1x3x64xf32>
    %61 = vector.shape_cast %60 : vector<1x3x64xf32> to vector<3x64xf32>
    %cst_27 = arith.constant dense<0.000000e+00> : vector<64x64xf32>
    %62 = tpu.matmul %42, %61, %cst_27 {dimension_numbers = #tpu.dot_dimension_numbers<[1], [0], [0], [1], [0, 0, 1, 1], [], []>} : vector<64x3xf32>, vector<3x64xf32>, vector<64x64xf32> -> vector<64x64xf32>
    %63 = vector.broadcast %59 : vector<64x1xf32> to vector<64x64xf32>
    %64 = arith.mulf %63, %62 : vector<64x64xf32>
    %65 = arith.addf %58, %64 : vector<64x64xf32>
    %c0_28 = arith.constant 0 : index
    %c0_29 = arith.constant 0 : index
    %66 = vector.load %arg6[%c0_28, %c0_29] : memref<1x64xf32, #tpu.memory_space<vmem>>, vector<1x64xf32>
    %67 = vector.broadcast %66 : vector<1x64xf32> to vector<64x64xf32>
    %68 = arith.addf %65, %67 : vector<64x64xf32>
    %cst_30 = arith.constant 0.000000e+00 : f32
    %69 = vector.broadcast %cst_30 : f32 to vector<64x64xf32>
    %70 = arith.maximumf %68, %69 : vector<64x64xf32>
    %71 = arith.truncf %70 : vector<64x64xf32> to vector<64x64xbf16>
    %c0_31 = arith.constant 0 : index
    %c0_32 = arith.constant 0 : index
    %72 = vector.load %arg7[%c0_31, %c0_32] : memref<64x64xbf16, #tpu.memory_space<vmem>>, vector<64x64xbf16>
    %cst_33 = arith.constant dense<0.000000e+00> : vector<64x64xf32>
    %73 = tpu.matmul %71, %72, %cst_33 {dimension_numbers = #tpu.dot_dimension_numbers<[1], [0], [0], [1], [0, 0, 1, 1], [], []>} : vector<64x64xbf16>, vector<64x64xbf16>, vector<64x64xf32> -> vector<64x64xf32>
    %c0_34 = arith.constant 0 : index
    %c0_35 = arith.constant 0 : index
    %74 = vector.load %arg8[%c0_34, %c0_35] : memref<1x64xf32, #tpu.memory_space<vmem>>, vector<1x64xf32>
    %75 = vector.broadcast %74 : vector<1x64xf32> to vector<64x64xf32>
    %76 = arith.addf %73, %75 : vector<64x64xf32>
    %cst_36 = arith.constant 0.000000e+00 : f32
    %77 = vector.broadcast %cst_36 : f32 to vector<64x64xf32>
    %78 = arith.maximumf %76, %77 : vector<64x64xf32>
    %79 = arith.truncf %78 : vector<64x64xf32> to vector<64x64xbf16>
    %c0_37 = arith.constant 0 : index
    %c0_38 = arith.constant 0 : index
    %80 = vector.load %arg9[%c0_37, %c0_38] : memref<64x64xbf16, #tpu.memory_space<vmem>>, vector<64x64xbf16>
    %cst_39 = arith.constant dense<0.000000e+00> : vector<64x64xf32>
    %81 = tpu.matmul %79, %80, %cst_39 {dimension_numbers = #tpu.dot_dimension_numbers<[1], [0], [0], [1], [0, 0, 1, 1], [], []>} : vector<64x64xbf16>, vector<64x64xbf16>, vector<64x64xf32> -> vector<64x64xf32>
    %c0_40 = arith.constant 0 : index
    %c0_41 = arith.constant 0 : index
    %82 = vector.load %arg10[%c0_40, %c0_41] : memref<1x64xf32, #tpu.memory_space<vmem>>, vector<1x64xf32>
    %83 = vector.broadcast %82 : vector<1x64xf32> to vector<64x64xf32>
    %84 = arith.addf %81, %83 : vector<64x64xf32>
    %cst_42 = arith.constant 0.000000e+00 : f32
    %85 = vector.broadcast %cst_42 : f32 to vector<64x64xf32>
    %86 = arith.maximumf %84, %85 : vector<64x64xf32>
    %c0_43 = arith.constant 0 : index
    %c0_44 = arith.constant 0 : index
    %c0_45 = arith.constant 0 : index
    %87 = vector.load %arg11[%c0_43, %c0_44, %c0_45] : memref<1x64x16xi32, #tpu.memory_space<vmem>>, vector<1x64x16xi32>
    %88 = vector.shape_cast %87 : vector<1x64x16xi32> to vector<64x16xi32>
    %89 = vector.shape_cast %35#1 : vector<64x16xi32> to vector<1x64x16xi32>
    tpu.vector_store %arg11[%c0_43, %c0_44, %c0_45], %89 {strides = array<i32>} : memref<1x64x16xi32, #tpu.memory_space<vmem>>, vector<1x64x16xi32>,
    %90 = arith.truncf %86 : vector<64x64xf32> to vector<64x64xbf16>
    %c0_46 = arith.constant 0 : index
    %c0_47 = arith.constant 0 : index
    %c0_48 = arith.constant 0 : index
    %91 = vector.load %arg12[%c0_46, %c0_47, %c0_48] : memref<1x64x64xbf16, #tpu.memory_space<vmem>>, vector<1x64x64xbf16>
    %92 = vector.shape_cast %91 : vector<1x64x64xbf16> to vector<64x64xbf16>
    %93 = vector.shape_cast %90 : vector<64x64xbf16> to vector<1x64x64xbf16>
    tpu.vector_store %arg12[%c0_46, %c0_47, %c0_48], %93 {strides = array<i32>} : memref<1x64x64xbf16, #tpu.memory_space<vmem>>, vector<1x64x64xbf16>,
    %cst_49 = arith.constant dense<0xFF800000> : vector<64xf32>
    %94 = vector.multi_reduction <maximumf>, %86, %cst_49 [0] : vector<64x64xf32> to vector<64xf32>
    %95 = vector.shape_cast %94 : vector<64xf32> to vector<1x64xf32>
    %c0_50 = arith.constant 0 : index
    %c0_51 = arith.constant 0 : index
    %c0_52 = arith.constant 0 : index
    %c0_53 = arith.constant 0 : index
    %96 = vector.load %arg13[%c0_50, %c0_51, %c0_52, %c0_53] : memref<1x1x1x64xf32, #tpu.memory_space<vmem>>, vector<1x1x1x64xf32>
    %97 = vector.shape_cast %96 : vector<1x1x1x64xf32> to vector<1x64xf32>
    %98 = vector.shape_cast %95 : vector<1x64xf32> to vector<1x1x1x64xf32>
    tpu.vector_store %arg13[%c0_50, %c0_51, %c0_52, %c0_53], %98 {strides = array<i32>} : memref<1x1x1x64xf32, #tpu.memory_space<vmem>>, vector<1x1x1x64xf32>,
    return
  }
  func.func @transform_0(%arg0: i32, %arg1: i32) -> (i32, i32, i32) {
    %c0_i32 = arith.constant 0 : i32
    %c0_i32_0 = arith.constant 0 : i32
    %c0_i32_1 = arith.constant 0 : i32
    return %arg0, %c0_i32, %c0_i32_0 : i32, i32, i32
  }
  func.func @transform_1(%arg0: i32, %arg1: i32) -> (i32, i32, i32) {
    %c0_i32 = arith.constant 0 : i32
    %c0_i32_0 = arith.constant 0 : i32
    %c0_i32_1 = arith.constant 0 : i32
    return %arg0, %c0_i32, %c0_i32_0 : i32, i32, i32
  }
  func.func @transform_2(%arg0: i32, %arg1: i32) -> (i32, i32) {
    %c0_i32 = arith.constant 0 : i32
    %c0_i32_0 = arith.constant 0 : i32
    %c0_i32_1 = arith.constant 0 : i32
    return %c0_i32, %c0_i32_0 : i32, i32
  }
  func.func @transform_3(%arg0: i32, %arg1: i32) -> (i32, i32, i32) {
    %c0_i32 = arith.constant 0 : i32
    %c0_i32_0 = arith.constant 0 : i32
    %c0_i32_1 = arith.constant 0 : i32
    %c0_i32_2 = arith.constant 0 : i32
    return %c0_i32, %c0_i32_0, %c0_i32_1 : i32, i32, i32
  }
  func.func @transform_4(%arg0: i32, %arg1: i32) -> (i32, i32) {
    %c0_i32 = arith.constant 0 : i32
    %c0_i32_0 = arith.constant 0 : i32
    %c0_i32_1 = arith.constant 0 : i32
    return %c0_i32, %c0_i32_0 : i32, i32
  }
  func.func @transform_5(%arg0: i32, %arg1: i32) -> (i32, i32) {
    %c0_i32 = arith.constant 0 : i32
    %c0_i32_0 = arith.constant 0 : i32
    %c0_i32_1 = arith.constant 0 : i32
    return %c0_i32, %c0_i32_0 : i32, i32
  }
  func.func @transform_6(%arg0: i32, %arg1: i32) -> (i32, i32) {
    %c0_i32 = arith.constant 0 : i32
    %c0_i32_0 = arith.constant 0 : i32
    %c0_i32_1 = arith.constant 0 : i32
    return %c0_i32, %c0_i32_0 : i32, i32
  }
  func.func @transform_7(%arg0: i32, %arg1: i32) -> (i32, i32) {
    %c0_i32 = arith.constant 0 : i32
    %c0_i32_0 = arith.constant 0 : i32
    %c0_i32_1 = arith.constant 0 : i32
    return %c0_i32, %c0_i32_0 : i32, i32
  }
  func.func @transform_8(%arg0: i32, %arg1: i32) -> (i32, i32) {
    %c0_i32 = arith.constant 0 : i32
    %c0_i32_0 = arith.constant 0 : i32
    %c0_i32_1 = arith.constant 0 : i32
    return %c0_i32, %c0_i32_0 : i32, i32
  }
  func.func @transform_9(%arg0: i32, %arg1: i32) -> (i32, i32, i32) {
    %c0_i32 = arith.constant 0 : i32
    %c0_i32_0 = arith.constant 0 : i32
    return %arg0, %arg1, %c0_i32 : i32, i32, i32
  }
  func.func @transform_10(%arg0: i32, %arg1: i32) -> (i32, i32, i32) {
    %c0_i32 = arith.constant 0 : i32
    %c0_i32_0 = arith.constant 0 : i32
    return %arg0, %arg1, %c0_i32 : i32, i32, i32
  }
  func.func @transform_11(%arg0: i32, %arg1: i32) -> (i32, i32, i32, i32) {
    %c0_i32 = arith.constant 0 : i32
    %c0_i32_0 = arith.constant 0 : i32
    %c0_i32_1 = arith.constant 0 : i32
    return %arg1, %arg0, %c0_i32, %c0_i32_0 : i32, i32, i32, i32
  }
}

</mosaic_0001>

<bundles_post_ra>
// kernel: tpu_custom_call.1
= control target key start
LH: loop header
LB: loop body
LE: loop exit
PB: predicated region body
PF: predicated region fallthrough
CT: control target
= control target key end

     0   :  { %s3877_s0 = inlined_call_operand.vmem [shape: f32[2,64,3], index: 0, kind: input, shape index: {}]   ;;  %s3878_s1 = inlined_call_operand.vmem [shape: f32[2,1,64], index: 1, kind: input, shape index: {}]   ;;  %s3879_s2 = inlined_call_operand.vmem [shape: f32[3,64], index: 2, kind: input, shape index: {}]   ;;  %s3880_s3 = inlined_call_operand.vmem [shape: f32[3,3,64], index: 3, kind: input, shape index: {}]   ;;  %s3881_s4 = inlined_call_operand.vmem [shape: f32[1,64], index: 4, kind: input, shape index: {}]   ;;  %s3882_s5 = inlined_call_operand.vmem [shape: bf16[64,64], index: 5, kind: input, shape index: {}]   ;;  %s3883_s6 = inlined_call_operand.vmem [shape: f32[1,64], index: 6, kind: input, shape index: {}]   ;;  %s3884_s7 = inlined_call_operand.vmem [shape: bf16[64,64], index: 7, kind: input, shape index: {}]   ;;  %s3885_s8 = inlined_call_operand.vmem [shape: f32[1,64], index: 8, kind: input, shape index: {}]   ;;  %s3886_s9 = inlined_call_operand.vmem [shape: s32[2,64,16], index: 9, kind: output, shape index: {0}]   ;;  %s3887_s10 = inlined_call_operand.hbm [shape: bf16[2,64,64], index: 10, kind: output, shape index: {1}]   ;;  %s3888_s11 = inlined_call_operand.hbm [shape: f32[1,2,1,64], index: 11, kind: output, shape index: {2}]  }
   0x1   :  { %3892 = sst [smem:[#allocation11_spill]] %s3877_s0 }
   0x2   :  { %3893 = sst [smem:[#allocation12_spill]] %s3878_s1 }
   0x3   :  { %3894 = sst [smem:[#allocation13_spill]] %s3879_s2 }
   0x4   :  { %17 = vsyncpa [#allocation3], 0 }
   0x5   :  { %19 = vsyncpa [#allocation3 + $0x1], 0 }
   0x6   :  { %20 = vsyncpa [#allocation5], 0 }
   0x7   :  { %22 = vsyncpa [#allocation5 + $0x1], 0  ;;  %s3175_s17 = smov 0   ;;  %s3177_s18 = smov 0  }
   0x8   :  { %s3179_s19 = smov 0   ;;  %s3181_s20 = smov 0  }
   0x9   :  { %s3183_s21 = smov 0   ;;  %s3185_s22 = smov 0  }
   0xa LB: > { %s2294_s23 = sadd.s32 4294967295, %s3037_s22   ;;  %s2295_s24 = sadd.s32 4294967294, %s3037_s22   ;;  %s3037_s22 = sphi %s3185_s22, %s28_s22   ;;  %s3033_s21 = sphi %s3183_s21, %s3932_s21   ;;  %s3029_s20 = sphi %s3181_s20, %s3931_s20   ;;  %s3025_s19 = sphi %s3179_s19, %s3930_s19   ;;  %s3021_s18 = sphi %s3177_s18, %s3929_s18   ;;  %s3017_s17 = sphi %s3175_s17, %s3928_s17  }
   0xb   : > { %s40_s25 = sadd.s32 1, %s3033_s21  ;;  %s276_s26 = sadd.s32 1, %s3025_s19 }
   0xc   : > { %p42_p0 = scmp.ge.s32.totalorder %s40_s25, 2  ;;  %p286_p1 = scmp.ne.s32.totalorder %s3025_s19, %s3021_s18 }
   0xd   : > { %p287_p2 = scmp.eq.s32.totalorder %s2294_s23, 1  ;;  %p292_p3 = scmp.ne.s32.totalorder %s3021_s18, %s3017_s17 }
   0xe   : > { %s3934_s25 = smov (%p42_p0, %s40_s25), 0  ;;  %p293_p5 = scmp.eq.s32.totalorder %s2295_s24, 1 }
   0xf   : > { %3895 = sst [smem:[#allocation8_spill]] %s3934_s25  ;;  %p3215_p4 = por %p287_p2, %p286_p1 }
  0x10   : > { %s271_s28 = ssub.s32 %s3033_s21, %s3934_s25  ;;  %p2298_p6 = scmp.ge.s32.totalorder %s3037_s22, 1 }
  0x11   : > { %p274_p7 = scmp.eq.s32.totalorder %s271_s28, 0  ;;  %p3222_p8 = por %p293_p5, %p292_p3 }
  0x12   : > { %p374_p9 = scmp.lt.s32.totalorder %s3037_s22, 3 }
  0x13   : > { %s3228_s30 = scalar_select %p274_p7, %s3025_s19, %s276_s26  }
  0x14   : > { %p375_p10 = pnand %p2298_p6, %p374_p9 }
  0x16   : > { %378 = sbr.rel (%p375_p10) target bundleno = 1606 (0x646), region = 56 }
  0x1b   : > { %s3231_s12 = sand.u32 1, %s3021_s18   ;;  %p430_p11 = scmp.lt.s32.totalorder %s3029_s20, 1  ;;  %vm469_vm0 = vcmask 23552   ;;  %v693_v31 = vlaneseq }
  0x1c   : > { %s2299_s13 = sshll.u32 %s3231_s12, 5  ;;  %s3898_s0 = sld [smem:[#allocation11_spill]] }
  0x1d   : > { %s3236_s14 = scalar_select %p430_p11, %s3029_s20, 1  ;;  %v3339_v40 = vand.u32 127, %v693_v31 }
  0x1e   : > { %s3899_s1 = sld [smem:[#allocation12_spill]] }
  0x1f   : > { %s2400_s15 = sshll.u32 %s3236_s14, 6  ;;  %v727_v51 = vsub.s32 63, %v3339_v40 }
  0x20   : > { %s3245_s25 = scalar_lea.vmem %s3886_s9, %s2400_s15 }
  0x22   : > { %s434_s24 = scalar_lea.vmem %s3898_s0, %s2400_s15 }
  0x23   : > { %v3247_v0 = vld [vmem:[%s434_s24 + $0x38] sm:$0xff]  ;;  %v3249_v1 = vld [vmem:[%s434_s24 + $0x30] sm:$0xff]  ;;  %v3259_v4 = vld [vmem:[%s434_s24 + $0x8] sm:$0xff] }
  0x24   : > { %2495 = vmatprep.subr.msk.mxu0 %vm469_vm0, %v3247_v0  ;;  %v3253_v2 = vld [vmem:[%s434_s24 + $0x18] sm:$0xff]  ;;  %v3255_v3 = vld [vmem:[%s434_s24 + $0x10] sm:$0xff]  ;;  %v3261_v5 = vld [vmem:[%s434_s24] sm:$0xff]  ;;  %v624_v9 = vmul.f32 %v3259_v4, %v3259_v4  ;;  %v630_v19 = vmul.f32 %v3247_v0, %v3247_v0  ;;  %v629_v21 = vmul.f32 %v3249_v1, %v3249_v1  ;;  %s437_s23 = scalar_lea.vmem %s3899_s1, %s3236_s14  ;;  %s3344_s14 = scalar_lea.vmem [#allocation2], %s2299_s13 }
  0x25   : > { %2496 = vmatpush3.xpose.msk.msra.mxu0 %vm469_vm0, %v3247_v0  ;;  %v625_v6 = vmul.f32 %v3255_v3, %v3255_v3  ;;  %v626_v7 = vmul.f32 %v3253_v2, %v3253_v2  ;;  %2511 = vmatprep.mubr.msk.f32.mxu0 %vm469_vm0, %v3261_v5  ;;  %v623_v8 = vmul.f32 %v3261_v5, %v3261_v5  ;;  %v3275_v10 = vld [vmem:[%s434_s24 + $0x28] sm:$0xff]  ;;  %v3281_v13 = vld [vmem:[%s434_s24 + $0x20] sm:$0xff]  ;;  %s3379_s13 = smov 0  }
  0x26   : > { %2497 = vmatprep.subr.msk.mxu0 %vm469_vm0, %v3249_v1  ;;  %v628_v15 = vmul.f32 %v3275_v10, %v3275_v10  ;;  %v634_v16 = vsel %vm469_vm0, %v624_v9, 0.0  ;;  %v627_v17 = vmul.f32 %v3281_v13, %v3281_v13  ;;  %v652_v22 = vsel %vm469_vm0, %v630_v19, 0.0  ;;  %v2320_v26 = vld [vmem:[%s437_s23] ss:$0 sm:$0xff] }
  0x27   : > { %v637_v11 = vsel %vm469_vm0, %v625_v6, 0.0  ;;  %v631_v12 = vsel %vm469_vm0, %v623_v8, 0.0  ;;  %v640_v14 = vsel %vm469_vm0, %v626_v7, 0.0  ;;  %v649_v23 = vsel %vm469_vm0, %v629_v21, 0.0 }
  0x28   : > { %638 = vadd.xlane.f32.xlu1 %v637_v11  ;;  %632 = vadd.xlane.f32.xlu0 %v631_v12  ;;  %v646_v18 = vsel %vm469_vm0, %v628_v15, 0.0  ;;  %v643_v20 = vsel %vm469_vm0, %v627_v17, 0.0 }
  0x29   : > { %2498 = vmatpush3.xpose.msk.msra.mxu0 %vm469_vm0, %v3249_v1 }
  0x2a   : > { %2499 = vmatprep.subr.msk.mxu0 %vm469_vm0, %v3275_v10 }
  0x2c   : > { %641 = vadd.xlane.f32.xlu1 %v640_v14  ;;  %635 = vadd.xlane.f32.xlu0 %v634_v16 }
  0x2d   : > { %2500 = vmatpush3.xpose.msk.msra.mxu0 %vm469_vm0, %v3275_v10 }
  0x2e   : > { %2501 = vmatprep.subr.msk.mxu0 %vm469_vm0, %v3281_v13 }
  0x30   : > { %647 = vadd.xlane.f32.xlu1 %v646_v18  ;;  %644 = vadd.xlane.f32.xlu0 %v643_v20 }
  0x31   : > { %2502 = vmatpush3.xpose.msk.msra.mxu0 %vm469_vm0, %v3281_v13 }
  0x32   : > { %2503 = vmatprep.subr.msk.mxu0 %vm469_vm0, %v3253_v2 }
  0x34   : > { %653 = vadd.xlane.f32.xlu1 %v652_v22  ;;  %650 = vadd.xlane.f32.xlu0 %v649_v23 }
  0x35   : > { %2504 = vmatpush3.xpose.msk.msra.mxu0 %vm469_vm0, %v3253_v2 }
  0x36   : > { %2505 = vmatprep.subr.msk.mxu0 %vm469_vm0, %v3255_v3 }
  0x39   : > { %2506 = vmatpush3.xpose.msk.msra.mxu0 %vm469_vm0, %v3255_v3 }
  0x3a   : > { %2507 = vmatprep.subr.msk.mxu0 %vm469_vm0, %v3259_v4 }
  0x3d   : > { %2508 = vmatpush3.xpose.msk.msra.mxu0 %vm469_vm0, %v3259_v4 }
  0x3e   : > { %2509 = vmatprep.subr.msk.mxu0 %vm469_vm0, %v3261_v5 }
  0x41   : > { %2510 = vmatpush3.xpose.msk.msra.mxu0 %vm469_vm0, %v3261_v5 }
  0x44   : > { %2512 = vmatmul.mubr.msk.f32.vlgmr.msra.gmra.mxu0 %vm469_vm0, %v3259_v4 }
  0x45   : > { %2514 = vmatprep.mubr.msk.f32.mxu0 %vm469_vm0, %v3255_v3 }
  0x48   : > { %2515 = vmatmul.mubr.msk.f32.gmra.mxu0 %vm469_vm0, %v3253_v2 }
  0x49   : > { %2517 = vmatprep.mubr.msk.f32.mxu0 %vm469_vm0, %v3281_v13 }
  0x4c   : > { %2518 = vmatmul.mubr.msk.f32.gmra.mxu0 %vm469_vm0, %v3275_v10 }
  0x4d   : > { %2520 = vmatprep.mubr.msk.f32.mxu0 %vm469_vm0, %v3249_v1 }
  0x50   : > { %2521 = vmatmul.mubr.msk.f32.gmra.mxu0 %vm469_vm0, %v3247_v0 }
  0xb1   : > { %v633_v24 = vpop.xlane.xlu0 %632  ;;  %v639_v25 = vpop.xlane.xlu1 %638 }
  0xb2   : > { %v661_v32 = vadd.f32 %v2320_v26, %v633_v24  ;;  %v663_v45 = vadd.f32 %v2320_v26, %v639_v25 }
  0xb5   : > { %v636_v27 = vpop.xlane.xlu0 %635  ;;  %v642_v28 = vpop.xlane.xlu1 %641 }
  0xb6   : > { %v662_v29 = vadd.f32 %v2320_v26, %v636_v27  ;;  %v664_v37 = vadd.f32 %v2320_v26, %v642_v28 }
  0xb9   : > { %v648_v38 = vpop.xlane.xlu1 %647  ;;  %v645_v39 = vpop.xlane.xlu0 %644 }
  0xba   : > { %v666_v52 = vadd.f32 %v2320_v26, %v648_v38  ;;  %v665_v61 = vadd.f32 %v2320_v26, %v645_v39 }
  0xbd   : > { %v654_v58 = vpop.xlane.xlu1 %653  ;;  %v651_v59 = vpop.xlane.xlu0 %650 }
  0xbe   : > { %v668_v12 = vadd.f32 %v2320_v26, %v654_v58  ;;  %v667_v15 = vadd.f32 %v2320_v26, %v651_v59  ;;  %v3355_v58 = vmov 0   ;;  %v3357_v59 = vmov 0  }
 0x104   : > { %v2513_v30 = vpop.f32.mrf.mxu0 }
 0x105   : > { %v670_v33 = vmul.f32 2.0, %v2513_v30 }
 0x106   : > { %v584_v34 = vpop.f32.mrf.mxu0 }
 0x107   : > { %v678_v35 = vsub.f32 %v662_v29, %v670_v33  ;;  %v669_v36 = vmul.f32 2.0, %v584_v34 }
 0x108   : > { %v2516_v41 = vpop.f32.mrf.mxu0 }
 0x109   : > { %v686_v42 = vmax.f32 %v678_v35, 0.0  ;;  %v677_v43 = vsub.f32 %v661_v32, %v669_v36  ;;  %v672_v44 = vmul.f32 2.0, %v2516_v41 }
 0x10a   : > { %v594_v46 = vpop.f32.mrf.mxu0 }
 0x10b   : > { %v704_v47 = vshra.s32 %v686_v42, 7  ;;  %v685_v48 = vmax.f32 %v677_v43, 0.0  ;;  %v680_v49 = vsub.f32 %v664_v37, %v672_v44  ;;  %v671_v50 = vmul.f32 2.0, %v594_v46 }
 0x10c   : > { %v2519_v53 = vpop.f32.mrf.mxu0 }
 0x10d   : > { %v712_v54 = vsub.s32 33554431, %v704_v47  ;;  %v703_v55 = vshra.s32 %v685_v48, 7  ;;  %v688_v56 = vmax.f32 %v680_v49, 0.0  ;;  %v679_v57 = vsub.f32 %v663_v45, %v671_v50 }
 0x10e   : > { %v674_v60 = vmul.f32 2.0, %v2519_v53  ;;  %v604_v62 = vpop.f32.mrf.mxu0 }
 0x10f   : > { %v720_v63 = vshll.u32 %v712_v54, 6  ;;  %v711_v6 = vsub.s32 33554431, %v703_v55  ;;  %v706_v7 = vshra.s32 %v688_v56, 7  ;;  %v687_v8 = vmax.f32 %v679_v57, 0.0 }
 0x110   : > { %v682_v9 = vsub.f32 %v666_v52, %v674_v60  ;;  %v673_v11 = vmul.f32 2.0, %v604_v62  ;;  %v2522_v14 = vpop.f32.mrf.mxu0  ;;  %v3347_v54 = vmov 0   ;;  %v3349_v55 = vmov 0  }
 0x111   : > { %v729_v16 = vor.u32 %v727_v51, %v720_v63   ;;  %v719_v17 = vshll.u32 %v711_v6, 6  ;;  %v714_v18 = vsub.s32 33554431, %v706_v7  ;;  %v705_v19 = vshra.s32 %v687_v8, 7 }
 0x112   : > { %v690_v20 = vmax.f32 %v682_v9, 0.0  ;;  %v681_v21 = vsub.f32 %v665_v61, %v673_v11  ;;  %v676_v22 = vmul.f32 2.0, %v2522_v14  ;;  %v614_v23 = vpop.f32.mrf.mxu0  ;;  %v3351_v56 = vmov 0  }
 0x113   : > { %v728_v24 = vor.u32 %v727_v51, %v719_v17   ;;  %v722_v25 = vshll.u32 %v714_v18, 6  ;;  %v713_v27 = vsub.s32 33554431, %v705_v19  ;;  %v675_v28 = vmul.f32 2.0, %v614_v23 }
 0x114   : > { %v708_v29 = vshra.s32 %v690_v20, 7  ;;  %v689_v30 = vmax.f32 %v681_v21, 0.0  ;;  %v684_v31 = vsub.f32 %v668_v12, %v676_v22  ;;  %v3353_v57 = vmov 0  }
 0x115   : > { %v731_v32 = vor.u32 %v727_v51, %v722_v25   ;;  %v721_v33 = vshll.u32 %v713_v27, 6  ;;  %v683_v34 = vsub.f32 %v667_v15, %v675_v28  ;;  %v3359_v60 = vmov 0  }
 0x116   : > { %v716_v35 = vsub.s32 33554431, %v708_v29  ;;  %v707_v26 = vshra.s32 %v689_v30, 7  ;;  %v692_v36 = vmax.f32 %v684_v31, 0.0  ;;  %v3361_v61 = vmov 0  }
 0x117   : > { %v730_v37 = vor.u32 %v727_v51, %v721_v33   ;;  %v691_v38 = vmax.f32 %v683_v34, 0.0 }
 0x118   : > { %v724_v39 = vshll.u32 %v716_v35, 6  ;;  %v715_v41 = vsub.s32 33554431, %v707_v26  ;;  %v710_v42 = vshra.s32 %v692_v36, 7 }
 0x119   : > { %v709_v43 = vshra.s32 %v691_v38, 7 }
 0x11a   : > { %v733_v44 = vor.u32 %v727_v51, %v724_v39   ;;  %v723_v45 = vshll.u32 %v715_v41, 6  ;;  %v718_v46 = vsub.s32 33554431, %v710_v42 }
 0x11b   : > { %v717_v47 = vsub.s32 33554431, %v709_v43 }
 0x11c   : > { %v732_v48 = vor.u32 %v727_v51, %v723_v45   ;;  %v726_v49 = vshll.u32 %v718_v46, 6 }
 0x11d   : > { %v725_v50 = vshll.u32 %v717_v47, 6 }
 0x11e   : > { %v735_v52 = vor.u32 %v727_v51, %v726_v49  }
 0x11f   : > { %v734_v53 = vor.u32 %v727_v51, %v725_v50  }
 0x120 LB: >> { %vm758_vm1 = vcmask 523264   ;;  %s3105_s13 = sphi %s3379_s13, %s741_s13   ;;  %v3101_v24 = vphi %v728_v24, %v3461_v24   ;;  %v3097_v16 = vphi %v729_v16, %v914_v16   ;;  %v3093_v37 = vphi %v730_v37, %v915_v37   ;;  %v3089_v32 = vphi %v731_v32, %v916_v32   ;;  %v3085_v48 = vphi %v732_v48, %v917_v48   ;;  %v3081_v44 = vphi %v733_v44, %v918_v44   ;;  %v3077_v53 = vphi %v734_v53, %v919_v53   ;;  %v3073_v52 = vphi %v735_v52, %v920_v52   ;;  %v3069_v61 = vphi %v3361_v61, %v3920_v61   ;;  %v3065_v60 = vphi %v3359_v60, %v3919_v60   ;;  %v3061_v59 = vphi %v3357_v59, %v3918_v59   ;;  %v3057_v58 = vphi %v3355_v58, %v3917_v58   ;;  %v3053_v57 = vphi %v3353_v57, %v3916_v57   ;;  %v3049_v56 = vphi %v3351_v56, %v3915_v56   ;;  %v3045_v55 = vphi %v3349_v55, %v3914_v55   ;;  %v3041_v54 = vphi %v3347_v54, %v3913_v54  }
 0x121   : >> { %v759_v51 = vsel %vm758_vm1, %v3101_v24, 2147483648  ;;  %v774_v62 = vsel %vm758_vm1, %v3097_v16, 2147483648  ;;  %v789_v63 = vsel %vm758_vm1, %v3093_v37, 2147483648  ;;  %v804_v9 = vsel %vm758_vm1, %v3089_v32, 2147483648 }
 0x122   : >> { %v761_v6 = vshra.s32 %v759_v51, 16  ;;  %v776_v7 = vshra.s32 %v774_v62, 16  ;;  %v791_v8 = vshra.s32 %v789_v63, 16  ;;  %v806_v11 = vshra.s32 %v804_v9, 16 }
 0x123   : >> { %v819_v17 = vsel %vm758_vm1, %v3085_v48, 2147483648  ;;  %v834_v20 = vsel %vm758_vm1, %v3081_v44, 2147483648  ;;  %v849_v22 = vsel %vm758_vm1, %v3077_v53, 2147483648  ;;  %v864_v23 = vsel %vm758_vm1, %v3073_v52, 2147483648 }
 0x124   : >> { %v763_v12 = vcvt.s32.f32 %v761_v6  ;;  %v793_v14 = vcvt.s32.f32 %v791_v8  ;;  %v778_v15 = vcvt.s32.f32 %v776_v7  ;;  %v808_v18 = vcvt.s32.f32 %v806_v11 }
 0x125   : >> { %v821_v19 = vshra.s32 %v819_v17, 16  ;;  %v836_v21 = vshra.s32 %v834_v20, 16  ;;  %v851_v28 = vshra.s32 %v849_v22, 16  ;;  %v866_v29 = vshra.s32 %v864_v23, 16 }
 0x126   : >> { %764 = vmax.xlane.f32.xlu0 %v763_v12  ;;  %794 = vmax.xlane.f32.xlu1 %v793_v14  ;;  %v760_v33 = vand.u32 65535, %v759_v51  ;;  %v790_v34 = vand.u32 65535, %v789_v63  ;;  %v775_v26 = vand.u32 65535, %v774_v62  ;;  %v805_v41 = vand.u32 65535, %v804_v9 }
 0x127   : >> { %v823_v25 = vcvt.s32.f32 %v821_v19  ;;  %v838_v27 = vcvt.s32.f32 %v836_v21  ;;  %v853_v30 = vcvt.s32.f32 %v851_v28  ;;  %v868_v31 = vcvt.s32.f32 %v866_v29 }
 0x128   : >> { %v762_v35 = vcvt.s32.f32 %v760_v33  ;;  %v792_v39 = vcvt.s32.f32 %v790_v34  ;;  %v777_v43 = vcvt.s32.f32 %v775_v26  ;;  %v820_v45 = vand.u32 65535, %v819_v17 }
 0x129   : >> { %v807_v50 = vcvt.s32.f32 %v805_v41  ;;  %v835_v6 = vand.u32 65535, %v834_v20  ;;  %v850_v62 = vand.u32 65535, %v849_v22 }
 0x12a   : >> { %779 = vmax.xlane.f32.xlu0 %v778_v15  ;;  %809 = vmax.xlane.f32.xlu1 %v808_v18  ;;  %v822_v63 = vcvt.s32.f32 %v820_v45 }
 0x12b   : >> { %v837_v11 = vcvt.s32.f32 %v835_v6  ;;  %v852_v17 = vcvt.s32.f32 %v850_v62 }
 0x12e   : >> { %824 = vmax.xlane.f32.xlu0 %v823_v25  ;;  %839 = vmax.xlane.f32.xlu1 %v838_v27 }
 0x132   : >> { %854 = vmax.xlane.f32.xlu0 %v853_v30  ;;  %869 = vmax.xlane.f32.xlu1 %v868_v31 }
 0x1af   : >> { %v765_v36 = vpop.xlane.xlu0 %764  ;;  %v795_v38 = vpop.xlane.xlu1 %794 }
 0x1b0   : >> { %vm766_vm2 = vcmp.eq.f32.partialorder %v763_v12, %v765_v36  ;;  %vm796_vm3 = vcmp.eq.f32.partialorder %v793_v14, %v795_v38  ;;  %v865_v12 = vand.u32 65535, %v864_v23  ;;  %v771_v28 = vcvt.f32.s32 %v765_v36 }
 0x1b1   : >> { %v767_v42 = vsel %vm766_vm2, %v762_v35, -inf  ;;  %v797_v47 = vsel %vm796_vm3, %v792_v39, -inf  ;;  %v801_v23 = vcvt.f32.s32 %v795_v38  ;;  %v895_v35 = vstv %s3105_s13  ;;  %s741_s13 = sadd.s32 1, %s3105_s13  }
 0x1b2   : >> { %768 = vmax.xlane.f32.xlu0 %v767_v42  ;;  %v772_v29 = vshll.u32 %v771_v28, 16  ;;  %vm3450_vm10 = vcmp.eq.s32.totalorder %v3339_v40, %v895_v35  ;;  %p3513_p12 = scmp.ge.s32.totalorder %s741_s13, 16  }
 0x1b3   : >> { %v780_v46 = vpop.xlane.xlu0 %779  ;;  %v810_v49 = vpop.xlane.xlu1 %809  ;;  %v802_v34 = vshll.u32 %v801_v23, 16  ;;  %2523 = vmatprep.subr.mxu1 (%p3513_p12), %v3247_v0  ;;  %2567 = vmatprep.mubr.msk.f32.mxu0 (%p3513_p12), %vm469_vm0, %v3261_v5  ;;  %v3107_v36 = vmov (%p3513_p12), 1   ;;  %s3921_s2 = sld [smem:[#allocation13_spill]] (%p3513_p12)  ;;  %s2075_s28 = sshll.u32 (%p3513_p12), %s3344_s14, 4  ;;  %s3802_s28 = int_to_ptr.vmem [resolvable:$true] %s2075_s28 }
 0x1b4   : >> { %vm781_vm4 = vcmp.eq.f32.partialorder %v778_v15, %v780_v46  ;;  %vm811_vm5 = vcmp.eq.f32.partialorder %v808_v18, %v810_v49  ;;  %v867_v18 = vcvt.s32.f32 %v865_v12  ;;  %v816_v41 = vcvt.f32.s32 %v810_v49  ;;  %2844 = vset.pattern.permute.xlu1 (%p3513_p12), %v3107_v36  ;;  %2843 = vset.pattern.permute.xlu0 (%p3513_p12), %v3107_v36  ;;  %s2863_s24 = scalar_lea.vmem (%p3513_p12), %s3802_s28, 512  ;;  %s3111_s13 = smov (%p3513_p12), [#allocation2]  }
 0x1b5   : >> { %v782_v51 = vsel %vm781_vm4, %v777_v43, -inf  ;;  %v812_v8 = vsel %vm811_vm5, %v807_v50, -inf  ;;  %2524 = vmatpush3.msra.mxu1 (%p3513_p12), %v3247_v0  ;;  %vm1117_vm5 = vcmask (%p3513_p12), 1042432   ;;  %p2864_p13 = scmp.ne.s32.totalorder (%p3513_p12), %s3802_s28, %s2863_s24  ;;  %s2867_s26 = sshll.u32 (%p3513_p12), %s3111_s13, 4  ;;  %s2868_s26 = int_to_ptr.vmem [resolvable:$false] %s2867_s26 }
 0x1b6   : >> { %798 = vmax.xlane.f32.xlu0 %v797_v47  ;;  %783 = vmax.xlane.f32.xlu1 %v782_v51  ;;  %v817_v62 = vshll.u32 %v816_v41, 16  ;;  %p2870_p2 = scmp.lt.s32.totalorder (%p3513_p12), %s3802_s28, %s2868_s26 }
 0x1b7   : >> { %v825_v7 = vpop.xlane.xlu0 %824  ;;  %v840_v9 = vpop.xlane.xlu1 %839  ;;  %2525 = vmatprep.subr.mxu1 (%p3513_p12), %v3249_v1  ;;  %p2865_p0 = pnand (%p3513_p12), %p2864_p13, %p3215_p4 }
 0x1b8   : >> { %vm826_vm6 = vcmp.eq.f32.partialorder %v823_v25, %v825_v7  ;;  %vm841_vm7 = vcmp.eq.f32.partialorder %v838_v27, %v840_v9  ;;  %v786_v25 = vcvt.f32.s32 %v780_v46  ;;  %v831_v42 = vcvt.f32.s32 %v825_v7  ;;  %2526 = vmatpush3.msra.mxu1 (%p3513_p12), %v3249_v1 }
 0x1b9   : >> { %v827_v14 = vsel %vm826_vm6, %v822_v63, -inf  ;;  %v842_v20 = vsel %vm841_vm7, %v837_v11, -inf  ;;  %v846_v43 = vcvt.f32.s32 %v840_v9  ;;  %2527 = vmatprep.subr.mxu1 (%p3513_p12), %v3275_v10  ;;  %p2866_p1 = pneg (%p3513_p12), %p2865_p0 }
 0x1ba   : >> { %828 = vmax.xlane.f32.xlu0 %v827_v14  ;;  %813 = vmax.xlane.f32.xlu1 %v812_v8  ;;  %v787_v39 = vshll.u32 %v786_v25, 16  ;;  %v832_v8 = vshll.u32 %v831_v42, 16 }
 0x1bb   : >> { %v855_v19 = vpop.xlane.xlu0 %854  ;;  %v870_v15 = vpop.xlane.xlu1 %869  ;;  %v847_v49 = vshll.u32 %v846_v43, 16  ;;  %2528 = vmatpush3.msra.mxu1 (%p3513_p12), %v3275_v10 }
 0x1bc   : >> { %vm856_vm8 = vcmp.eq.f32.partialorder %v853_v30, %v855_v19  ;;  %vm871_vm9 = vcmp.eq.f32.partialorder %v868_v31, %v870_v15  ;;  %v861_v6 = vcvt.f32.s32 %v855_v19  ;;  %v876_v51 = vcvt.f32.s32 %v870_v15  ;;  %2529 = vmatprep.subr.mxu1 (%p3513_p12), %v3281_v13 }
 0x1bd   : >> { %v857_v21 = vsel %vm856_vm8, %v852_v17, -inf  ;;  %v872_v22 = vsel %vm871_vm9, %v867_v18, -inf  ;;  %2530 = vmatpush3.msra.mxu1 (%p3513_p12), %v3281_v13 }
 0x1be   : >> { %858 = vmax.xlane.f32.xlu0 %v857_v21  ;;  %843 = vmax.xlane.f32.xlu1 %v842_v20  ;;  %v862_v20 = vshll.u32 %v861_v6, 16  ;;  %v877_v15 = vshll.u32 %v876_v51, 16 }
 0x1bf   : > { %2531 = vmatprep.subr.mxu1 (%p3513_p12), %v3253_v2 }
 0x1c0   : > { %2532 = vmatpush3.msra.mxu1 (%p3513_p12), %v3253_v2 }
 0x1c1   : > { %2533 = vmatprep.subr.mxu1 (%p3513_p12), %v3255_v3 }
 0x1c2   : >> { %873 = vmax.xlane.f32.xlu1 %v872_v22  ;;  %2534 = vmatpush3.msra.mxu1 (%p3513_p12), %v3255_v3 }
 0x1c3   : > { %2535 = vmatprep.subr.mxu1 (%p3513_p12), %v3259_v4 }
 0x1c4   : > { %2536 = vmatpush3.msra.mxu1 (%p3513_p12), %v3259_v4 }
 0x1c5   : > { %2537 = vmatprep.subr.mxu1 (%p3513_p12), %v3261_v5 }
 0x1c6   : > { %2538 = vmatpush3.msra.mxu1 (%p3513_p12), %v3261_v5 }
 0x23b   : >> { %v769_v27 = vpop.xlane.xlu0 %768 }
 0x23c   : >> { %v770_v33 = vcvt.f32.s32 %v769_v27 }
 0x23e   : >> { %v773_v26 = vadd.s32 %v772_v29, %v770_v33 }
 0x23f   : >> { %v799_v30 = vpop.xlane.xlu0 %798  ;;  %v784_v31 = vpop.xlane.xlu1 %783 }
 0x240   : >> { %v879_v45 = vand.u32 63, %v773_v26  ;;  %v800_v47 = vcvt.f32.s32 %v799_v30  ;;  %v785_v50 = vcvt.f32.s32 %v784_v31 }
 0x242   : >> { %v887_v38 = vsub.s32 63, %v879_v45  ;;  %v803_v46 = vadd.s32 %v802_v34, %v800_v47  ;;  %v788_v63 = vadd.s32 %v787_v39, %v785_v50 }
 0x243   : >> { %v829_v7 = vpop.xlane.xlu0 %828  ;;  %v814_v9 = vpop.xlane.xlu1 %813 }
 0x244   : >> { %v3457_v61 = vsel %vm3450_vm10, %v887_v38, %v3069_v61   ;;  %vm905_vm11 = vcmp.eq.s32.totalorder %v3339_v40, %v887_v38  ;;  %v881_v12 = vand.u32 63, %v803_v46  ;;  %v880_v14 = vand.u32 63, %v788_v63 }
 0x245   : >> { %v3902_v11 = vmov %v3457_v61  ;;  %v3461_v24 = vsel %vm905_vm11, 4294967295, %v3101_v24   ;;  %v830_v17 = vcvt.f32.s32 %v829_v7  ;;  %v815_v19 = vcvt.f32.s32 %v814_v9 }
 0x246   : >> { %v889_v18 = vsub.s32 63, %v881_v12  ;;  %v888_v21 = vsub.s32 63, %v880_v14  ;;  %922 = vperm.xlu0 (%p3513_p12), %2843, %v3902_v11   ;;  %v1092_v24 = vld [vmem:[%s3880_s3] sm:$0x7] (%p3513_p12) }
 0x247   : >> { %v833_v22 = vadd.s32 %v832_v8, %v830_v17  ;;  %v818_v28 = vadd.s32 %v817_v62, %v815_v19  ;;  %v859_v23 = vpop.xlane.xlu0 %858  ;;  %v844_v25 = vpop.xlane.xlu1 %843  ;;  %2551 = vmatprep.subr.msk.mxu1 (%p3513_p12), %vm1117_vm5, %v1092_v24  ;;  %v2357_v17 = vld [vmem:[%s3880_s3 + $0x8] sm:$0x7] (%p3513_p12)  ;;  %v3109_v19 = vmov (%p3513_p12), 0  }
 0x248   : >> { %v3466_v59 = vsel %vm3450_vm10, %v889_v18, %v3061_v59   ;;  %vm907_vm12 = vcmp.eq.s32.totalorder %v3339_v40, %v889_v18  ;;  %v3472_v60 = vsel %vm3450_vm10, %v888_v21, %v3065_v60   ;;  %vm906_vm13 = vcmp.eq.s32.totalorder %v3339_v40, %v888_v21 }
 0x249   : >> { %v3903_v27 = vmov %v3466_v59  ;;  %v3904_v29 = vmov %v3472_v60  ;;  %v915_v37 = vsel %vm907_vm12, 4294967295, %v3093_v37   ;;  %v914_v16 = vsel %vm906_vm13, 4294967295, %v3097_v16  }
 0x24a   : >> { %v883_v61 = vand.u32 63, %v833_v22  ;;  %v882_v33 = vand.u32 63, %v818_v28  ;;  %v860_v34 = vcvt.f32.s32 %v859_v23  ;;  %v845_v35 = vcvt.f32.s32 %v844_v25  ;;  %928 = vperm.xlu1 (%p3513_p12), %2844, %v3903_v27   ;;  %925 = vperm.xlu0 (%p3513_p12), %2843, %v3904_v29   ;;  %v3589_v16 = vld [vmem:[%s3921_s2] sm:$0x7] (%p3513_p12)  ;;  %v2859_v28 = vld [vmem:[%s3884_s7 + $0x18] sm:$0xff] (%p3513_p12)  }
 0x24b   : >> { %v874_v59 = vpop.xlane.xlu1 %873  ;;  %2565 = vmatprep.subr.msk.mxu0 (%p3513_p12), %vm1117_vm5, %v3589_v16 }
 0x24c   : >> { %v891_v26 = vsub.s32 63, %v883_v61  ;;  %v890_v39 = vsub.s32 63, %v882_v33  ;;  %v863_v41 = vadd.s32 %v862_v20, %v860_v34  ;;  %v848_v42 = vadd.s32 %v847_v49, %v845_v35  ;;  %2566 = vmatpush3.msk.msra.mxu0 (%p3513_p12), %vm1117_vm5, %v3589_v16 }
 0x24d   : >> { %v875_v43 = vcvt.f32.s32 %v874_v59  ;;  %v3918_v59 = vmov %v3903_v27  ;;  %v3920_v61 = vmov %v3902_v11  ;;  %2568 = vmatmul.mubr.msk.f32.vlgmr.msra.gmra.mxu0 (%p3513_p12), %vm469_vm0, %v3259_v4  ;;  %2593 = vmatprep.subr.msk.mxu0 (%p3513_p12), %vm1117_vm5, %v2357_v17 }
 0x24e   : >> { %v3480_v57 = vsel %vm3450_vm10, %v891_v26, %v3053_v57   ;;  %vm909_vm14 = vcmp.eq.s32.totalorder %v3339_v40, %v891_v26  ;;  %v3486_v58 = vsel %vm3450_vm10, %v890_v39, %v3057_v58   ;;  %vm908_vm15 = vcmp.eq.s32.totalorder %v3339_v40, %v890_v39  ;;  %2570 = vmatprep.mubr.msk.f32.mxu0 (%p3513_p12), %vm469_vm0, %v3255_v3 }
 0x24f   : >> { %v3905_v30 = vmov %v3480_v57  ;;  %v3906_v31 = vmov %v3486_v58  ;;  %v917_v48 = vsel %vm909_vm14, 4294967295, %v3085_v48   ;;  %v916_v32 = vsel %vm908_vm15, 4294967295, %v3089_v32   ;;  %2594 = vmatpush3.msk.msra.mxu0 (%p3513_p12), %vm1117_vm5, %v2357_v17 }
 0x250   : >> { %v885_v60 = vand.u32 63, %v863_v41  ;;  %v884_v45 = vand.u32 63, %v848_v42  ;;  %v878_v47 = vadd.s32 %v877_v15, %v875_v43  ;;  %v3917_v58 = vmov %v3906_v31  ;;  %931 = vperm.xlu1 (%p3513_p12), %2844, %v3906_v31   ;;  %934 = vperm.xlu0 (%p3513_p12), %2843, %v3905_v30  }
 0x251   : > { %2571 = vmatmul.mubr.msk.f32.gmra.mxu0 (%p3513_p12), %vm469_vm0, %v3253_v2  ;;  %2623 = vmatprep.subr.bf16.mxu0 (%p3513_p12), %v2859_v28  ;;  %vm2010_vm14 = vcmask (%p3513_p12), 519168  }
 0x252   : >> { %v893_v50 = vsub.s32 63, %v885_v60  ;;  %v892_v6 = vsub.s32 63, %v884_v45  ;;  %v886_v51 = vand.u32 63, %v878_v47  ;;  %v3919_v60 = vmov %v3904_v29 }
 0x254   : >> { %v3494_v55 = vsel %vm3450_vm10, %v893_v50, %v3045_v55   ;;  %vm911_vm2 = vcmp.eq.s32.totalorder %v3339_v40, %v893_v50  ;;  %v3500_v56 = vsel %vm3450_vm10, %v892_v6, %v3049_v56   ;;  %vm910_vm3 = vcmp.eq.s32.totalorder %v3339_v40, %v892_v6 }
 0x255   : >> { %3907 = vst [vmem:[#allocation9_spill] sm:$0xff] %v3494_v55  ;;  %v3908_v38 = vmov %v3494_v55  ;;  %v3909_v46 = vmov %v3500_v56  ;;  %v919_v53 = vsel %vm911_vm2, 4294967295, %v3077_v53   ;;  %v918_v44 = vsel %vm910_vm3, 4294967295, %v3081_v44  }
 0x256   : >> { %v894_v57 = vsub.s32 63, %v886_v51  ;;  %v3914_v55 = vmov %v3908_v38  ;;  %v3915_v56 = vmov %v3909_v46  ;;  %740 = sbr.rel (!%p3513_p12) target bundleno = 288 (0x120), region = 133  ;;  %937 = vperm.xlu1 (%p3513_p12), %2844, %v3909_v46   ;;  %940 = vperm.xlu0 (%p3513_p12), %2843, %v3908_v38   ;;  %v3108_v44 = vmov (%p3513_p12), 0.0  }
 0x258   : >> { %v3508_v54 = vsel %vm3450_vm10, %v894_v57, %v3041_v54   ;;  %vm912_vm4 = vcmp.eq.s32.totalorder %v3339_v40, %v894_v57  ;;  %v3916_v57 = vmov %v3905_v30 }
 0x259   : >> { %3910 = vst [vmem:[#allocation10_spill] sm:$0xff] %v3508_v54  ;;  %v3911_v63 = vmov %v3508_v54  ;;  %v920_v52 = vsel %vm912_vm4, 4294967295, %v3073_v52  }
 0x25a   : >> { %v3913_v54 = vmov %v3911_v63  ;;  %943 = vperm.xlu1 (%p3513_p12), %2844, %v3911_v63  }
 0x25e   : > { %2845 = vset.pattern.permute.xlu1 %v3109_v19 }
 0x25f   : > { %1231 = vperm.xlu1 %2845, %v3259_v4  }
 0x263   : > { %1235 = vperm.xlu1 %2845, %v3255_v3  }
 0x267   : > { %2846 = vset.pattern.permute.xlu1 %v3107_v36 }
 0x268   : > { %1485 = vperm.xlu1 %2846, %v3261_v5  }
 0x26c   : > { %1493 = vperm.xlu1 %2846, %v3255_v3  }
 0x270   : > { %1497 = vperm.xlu1 %2846, %v3253_v2  }
 0x2c1   : > { %v923_v37 = vpop.permute.xlu0 %922 }
 0x2c2   : > { %vm945_vm6 = vcmp.eq.s32.totalorder %v3339_v40, %v923_v37 }
 0x2c3   : > { %v953_v48 = vsel %vm945_vm6, 1.0, %v3108_v44 }
 0x2c4   : > { %2539 = vmatprep.mubr.msk.f32.mxu1 %vm758_vm1, %v953_v48 }
 0x2c5   : > { %v929_v32 = vpop.permute.xlu1 %928  ;;  %v926_v53 = vpop.permute.xlu0 %925 }
 0x2c6   : > { %vm947_vm7 = vcmp.eq.s32.totalorder %v3339_v40, %v929_v32  ;;  %vm946_vm8 = vcmp.eq.s32.totalorder %v3339_v40, %v926_v53 }
 0x2c7   : > { %v955_v54 = vsel %vm947_vm7, 1.0, %v3108_v44  ;;  %v954_v55 = vsel %vm946_vm8, 1.0, %v3108_v44 }
 0x2c8   : > { %2540 = vmatmul.mubr.msk.f32.vlgmr.msra.gmra.mxu1 %vm758_vm1, %v954_v55 }
 0x2c9   : > { %2542 = vmatprep.mubr.msk.f32.mxu1 %vm758_vm1, %v955_v54  ;;  %2552 = vmatpush3.msk.msra.mxu1 %vm1117_vm5, %v1092_v24 }
 0x2ca   : > { %2639 = vmatprep.subr.msk.mxu1 %vm1117_vm5, %v3589_v16 }
 0x2cb   : > { %v932_v52 = vpop.permute.xlu1 %931  ;;  %v935_v58 = vpop.permute.xlu0 %934 }
 0x2cc   : > { %vm948_vm9 = vcmp.eq.s32.totalorder %v3339_v40, %v932_v52  ;;  %vm949_vm10 = vcmp.eq.s32.totalorder %v3339_v40, %v935_v58 }
 0x2cd   : > { %v956_v62 = vsel %vm948_vm9, 1.0, %v3108_v44  ;;  %v957_v8 = vsel %vm949_vm10, 1.0, %v3108_v44 }
 0x2ce   : > { %2543 = vmatmul.mubr.msk.f32.gmra.mxu1 %vm758_vm1, %v956_v62 }
 0x2cf   : > { %2545 = vmatprep.mubr.msk.f32.mxu1 %vm758_vm1, %v957_v8 }
 0x2d1   : > { %v938_v56 = vpop.permute.xlu1 %937  ;;  %v941_v7 = vpop.permute.xlu0 %940 }
 0x2d2   : > { %vm950_vm11 = vcmp.eq.s32.totalorder %v3339_v40, %v938_v56  ;;  %vm951_vm12 = vcmp.eq.s32.totalorder %v3339_v40, %v941_v7 }
 0x2d3   : > { %v958_v9 = vsel %vm950_vm11, 1.0, %v3108_v44  ;;  %v959_v12 = vsel %vm951_vm12, 1.0, %v3108_v44 }
 0x2d4   : > { %2546 = vmatmul.mubr.msk.f32.gmra.mxu1 %vm758_vm1, %v958_v9 }
 0x2d5   : > { %v944_v49 = vpop.permute.xlu1 %943  ;;  %2548 = vmatprep.mubr.msk.f32.mxu1 %vm758_vm1, %v959_v12 }
 0x2d6   : > { %vm952_vm13 = vcmp.eq.s32.totalorder %v3339_v40, %v944_v49  ;;  %v3110_v40 = vmov 2  }
 0x2d7   : > { %v960_v14 = vsel %vm952_vm13, 1.0, %v3108_v44  ;;  %2847 = vset.pattern.permute.xlu0 %v3110_v40  ;;  %2848 = vset.pattern.permute.xlu1 %v3110_v40 }
 0x2d8   : > { %2549 = vmatmul.mubr.msk.f32.gmra.mxu1 %vm758_vm1, %v960_v14  ;;  %1643 = vperm.xlu0 %2847, %v3261_v5  }
 0x2d9   : > { %1647 = vperm.xlu1 %2848, %v3259_v4  }
 0x2da   : > { %v1232_v23 = vpop.permute.xlu1 %1231 }
 0x2dc   : > { %1655 = vperm.xlu0 %2847, %v3253_v2  }
 0x2dd   : > { %1651 = vperm.xlu1 %2848, %v3255_v3  }
 0x2de   : > { %v1236_v25 = vpop.permute.xlu1 %1235 }
 0x2e0   : > { %2849 = vset.pattern.permute.xlu0 %v3109_v19 }
 0x2e1   : > { %1227 = vperm.xlu0 %2849, %v3261_v5   ;;  %2850 = vset.pattern.permute.xlu1 %v3109_v19 }
 0x2e2   : > { %1243 = vperm.xlu1 %2850, %v3281_v13  }
 0x2e3   : > { %v1486_v61 = vpop.permute.xlu1 %1485 }
 0x2e5   : > { %1239 = vperm.xlu0 %2849, %v3253_v2  }
 0x2e6   : > { %1251 = vperm.xlu1 %2850, %v3249_v1  }
 0x2e7   : > { %v3714_v33 = vpop.permute.xlu1 %1493 }
 0x2e9   : > { %1247 = vperm.xlu0 %2849, %v3275_v10  }
 0x2ea   : > { %1255 = vperm.xlu1 %2850, %v3247_v0  }
 0x2eb   : > { %v1498_v34 = vpop.permute.xlu1 %1497 }
 0x2ed   : > { %2851 = vset.pattern.permute.xlu0 %v3107_v36 }
 0x2ee   : > { %1489 = vperm.xlu0 %2851, %v3259_v4   ;;  %2852 = vset.pattern.permute.xlu1 %v3107_v36  ;;  %v2347_v4 = vld [vmem:[%s3880_s3 + $0x4] sm:$0x7] }
 0x2ef   : > { %1505 = vperm.xlu1 %2852, %v3275_v10  }
 0x2f2   : > { %1501 = vperm.xlu0 %2851, %v3281_v13  }
 0x2f3   : > { %1509 = vperm.xlu1 %2852, %v3249_v1  }
 0x2f6   : > { %1513 = vperm.xlu0 %2851, %v3247_v0  }
 0x2f7   : > { %2853 = vset.pattern.permute.xlu1 %v3110_v40 }
 0x2f8   : > { %1659 = vperm.xlu1 %2853, %v3281_v13  }
 0x2fa   : > { %2854 = vset.pattern.permute.xlu0 %v3110_v40 }
 0x2fb   : > { %1663 = vperm.xlu0 %2854, %v3275_v10  }
 0x2fc   : > { %1667 = vperm.xlu1 %2853, %v3249_v1  }
 0x300   : > { %1671 = vperm.xlu1 %2853, %v3247_v0  }
 0x30d   : > { %v2569_v41 = vpop.f32.mrf.mxu0 }
 0x30f   : > { %v1335_v60 = vpop.f32.mrf.mxu0 }
 0x311   : > { %v2572_v6 = vpop.f32.mrf.mxu0 }
 0x313   : > { %v1345_v36 = vpop.f32.mrf.mxu0 }
 0x353   : > { %v1644_v26 = vpop.permute.xlu0 %1643 }
 0x354   : > { %v1648_v35 = vpop.permute.xlu1 %1647 }
 0x357   : > { %v1656_v59 = vpop.permute.xlu0 %1655 }
 0x358   : > { %v3716_v39 = vpop.permute.xlu1 %1651 }
 0x35c   : > { %v1228_v43 = vpop.permute.xlu0 %1227 }
 0x35d   : > { %v1244_v42 = vpop.permute.xlu1 %1243 }
 0x360   : > { %v1240_v50 = vpop.permute.xlu0 %1239 }
 0x361   : > { %v3718_v47 = vpop.permute.xlu1 %1251 }
 0x364   : > { %v1248_v32 = vpop.permute.xlu0 %1247 }
 0x365   : > { %v1256_v24 = vpop.permute.xlu1 %1255 }
 0x369   : > { %v1490_v54 = vpop.permute.xlu0 %1489 }
 0x36a   : > { %v1506_v53 = vpop.permute.xlu1 %1505 }
 0x36d   : > { %v1502_v7 = vpop.permute.xlu0 %1501 }
 0x36e   : > { %v3720_v49 = vpop.permute.xlu1 %1509 }
 0x388   : > { %v2541_v2 = vpop.f32.mrf.mxu1 }
 0x38a   : > { %v1052_v3 = vpop.f32.mrf.mxu1 }
 0x38b   : > { %2553 = vmatprep.mubr.msk.f32.mxu1 %vm469_vm0, %v1052_v3  ;;  %2595 = vmatprep.mubr.msk.f32.mxu0 %vm469_vm0, %v1052_v3 }
 0x38c   : > { %2554 = vmatmul.mubr.msk.f32.vlgmr.msra.gmra.mxu1 %vm469_vm0, %v2541_v2  ;;  %2596 = vmatmul.mubr.msk.f32.vlgmr.msra.gmra.mxu0 %vm469_vm0, %v2541_v2 }
 0x38d   : > { %2640 = vmatpush3.msk.msra.mxu1 %vm1117_vm5, %v3589_v16  ;;  %2624 = vmatpush3.bf16.msra.mxu0 %v2859_v28 }
 0x38e   : > { %v2544_v5 = vpop.f32.mrf.mxu1  ;;  %2579 = vmatprep.subr.msk.mxu1 %vm1117_vm5, %v2347_v4 }
 0x390   : > { %v1062_v20 = vpop.f32.mrf.mxu1 }
 0x391   : > { %2556 = vmatprep.mubr.msk.f32.mxu1 %vm469_vm0, %v1062_v20  ;;  %2598 = vmatprep.mubr.msk.f32.mxu0 %vm469_vm0, %v1062_v20 }
 0x392   : > { %2557 = vmatmul.mubr.msk.f32.gmra.mxu1 %vm469_vm0, %v2544_v5  ;;  %2599 = vmatmul.mubr.msk.f32.gmra.mxu0 %vm469_vm0, %v2544_v5 }
 0x394   : > { %v2547_v15 = vpop.f32.mrf.mxu1 }
 0x396   : > { %v1072_v18 = vpop.f32.mrf.mxu1 }
 0x397   : > { %2559 = vmatprep.mubr.msk.f32.mxu1 %vm469_vm0, %v1072_v18  ;;  %2601 = vmatprep.mubr.msk.f32.mxu0 %vm469_vm0, %v1072_v18 }
 0x398   : > { %v2550_v21 = vpop.f32.mrf.mxu1  ;;  %2560 = vmatmul.mubr.msk.f32.gmra.mxu1 %vm469_vm0, %v2547_v15  ;;  %2602 = vmatmul.mubr.msk.f32.gmra.mxu0 %vm469_vm0, %v2547_v15 }
 0x39a   : > { %v1082_v22 = vpop.f32.mrf.mxu1 }
 0x39b   : > { %2562 = vmatprep.mubr.msk.f32.mxu1 %vm469_vm0, %v1082_v22  ;;  %2604 = vmatprep.mubr.msk.f32.mxu0 %vm469_vm0, %v1082_v22 }
 0x39c   : > { %2563 = vmatmul.mubr.msk.f32.gmra.mxu1 %vm469_vm0, %v2550_v21  ;;  %2605 = vmatmul.mubr.msk.f32.gmra.mxu0 %vm469_vm0, %v2550_v21 }
 0x39d   : > { %2573 = vmatprep.mubr.msk.f32.mxu1 %vm469_vm0, %v3281_v13  ;;  %v2858_v13 = vld [vmem:[%s3882_s5] sm:$0xff]  }
 0x3a0   : > { %2574 = vmatmul.mubr.msk.f32.vlgmr.msra.gmra.mxu1 %vm469_vm0, %v3275_v10  ;;  %v2857_v10 = vld [vmem:[%s3882_s5 + $0x8] sm:$0xff]  }
 0x3a1   : > { %2580 = vmatpush3.msk.msra.mxu1 %vm1117_vm5, %v2347_v4  ;;  %2576 = vmatprep.mubr.msk.f32.mxu1 %vm469_vm0, %v3249_v1  ;;  %v2856_v1 = vld [vmem:[%s3882_s5 + $0x10] sm:$0xff]  }
 0x3a4   : > { %2577 = vmatmul.mubr.msk.f32.gmra.mxu1 %vm469_vm0, %v3247_v0  ;;  %v2855_v0 = vld [vmem:[%s3882_s5 + $0x18] sm:$0xff]  }
 0x3a5   : > { %2581 = vmatprep.mubr.msk.f32.mxu1 %vm469_vm0, %v1052_v3  ;;  %2607 = vmatprep.subr.bf16.mxu1 %v2855_v0  ;;  %v1660_v3 = vpop.permute.xlu1 %1659 }
 0x3a8   : > { %2582 = vmatmul.mubr.msk.f32.vlgmr.msra.gmra.mxu1 %vm469_vm0, %v2541_v2 }
 0x3a9   : > { %2584 = vmatprep.mubr.msk.f32.mxu1 %vm469_vm0, %v1062_v20  ;;  %2608 = vmatpush3.bf16.msra.mxu1 %v2855_v0 }
 0x3aa   : > { %2609 = vmatprep.subr.bf16.mxu1 %v2856_v1 }
 0x3ac   : > { %2585 = vmatmul.mubr.msk.f32.gmra.mxu1 %vm469_vm0, %v2544_v5  ;;  %v1514_v5 = vpop.permute.xlu0 %1513 }
 0x3ad   : > { %2587 = vmatprep.mubr.msk.f32.mxu1 %vm469_vm0, %v1072_v18  ;;  %2610 = vmatpush3.bf16.msra.mxu1 %v2856_v1 }
 0x3ae   : > { %2611 = vmatprep.subr.bf16.mxu1 %v2857_v10 }
 0x3b0   : > { %2588 = vmatmul.mubr.msk.f32.gmra.mxu1 %vm469_vm0, %v2547_v15 }
 0x3b1   : > { %2590 = vmatprep.mubr.msk.f32.mxu1 %vm469_vm0, %v1082_v22  ;;  %2612 = vmatpush3.bf16.msra.mxu1 %v2857_v10 }
 0x3b2   : > { %2613 = vmatprep.subr.bf16.mxu1 %v2858_v13 }
 0x3b4   : > { %2591 = vmatmul.mubr.msk.f32.gmra.mxu1 %vm469_vm0, %v2550_v21  ;;  %vm1969_vm0 = vcmask 130048  }
 0x3b5   : > { %2614 = vmatpush3.bf16.msra.mxu1 %v2858_v13  ;;  %1970 = vst.msk [vmem:[%s3245_s25] sm:$0xff] %vm1969_vm0, %v3902_v11  ;;  %1971 = vst.msk [vmem:[%s3245_s25 + $0x8] sm:$0xff] %vm1969_vm0, %v3904_v29 }
 0x3b6   : > { %1972 = vst.msk [vmem:[%s3245_s25 + $0x10] sm:$0xff] %vm1969_vm0, %v3903_v27  ;;  %1973 = vst.msk [vmem:[%s3245_s25 + $0x18] sm:$0xff] %vm1969_vm0, %v3906_v31 }
 0x3b7   : > { %1974 = vst.msk [vmem:[%s3245_s25 + $0x20] sm:$0xff] %vm1969_vm0, %v3905_v30  ;;  %1975 = vst.msk [vmem:[%s3245_s25 + $0x28] sm:$0xff] %vm1969_vm0, %v3909_v46 }
 0x44c   : > { %v2555_v45 = vpop.f32.mrf.mxu1  ;;  %v2597_v44 = vpop.f32.mrf.mxu0 }
 0x44d   : > { %v1259_v12 = vmul.f32 %v2555_v45, %v1232_v23  ;;  %v1675_v15 = vmul.f32 %v2597_v44, %v1648_v35 }
 0x44e   : > { %v1187_v51 = vpop.f32.mrf.mxu1  ;;  %v1603_v55 = vpop.f32.mrf.mxu0 }
 0x44f   : > { %v1258_v19 = vmul.f32 %v1228_v43, %v1187_v51  ;;  %v1341_v2 = vadd.f32 %v2569_v41, %v1259_v12  ;;  %v1674_v13 = vmul.f32 %v1644_v26, %v1603_v55  ;;  %v3725_v41 = vld [vmem:[%s3881_s4] ss:$0 sm:$0xff] }
 0x451   : > { %v1336_v22 = vadd.f32 %v1335_v60, %v1258_v19  ;;  %v1668_v60 = vpop.permute.xlu1 %1667 }
 0x452   : > { %v2558_v57 = vpop.f32.mrf.mxu1  ;;  %v2600_v62 = vpop.f32.mrf.mxu0 }
 0x453   : > { %v1261_v4 = vmul.f32 %v2558_v57, %v1240_v50  ;;  %v1677_v43 = vmul.f32 %v2600_v62, %v1656_v59 }
 0x454   : > { %v1197_v16 = vpop.f32.mrf.mxu1  ;;  %v1613_v14 = vpop.f32.mrf.mxu0 }
 0x455   : > { %v1260_v0 = vmul.f32 %v1236_v25, %v1197_v16  ;;  %v1351_v63 = vadd.f32 %v2572_v6, %v1261_v4  ;;  %v1664_v25 = vpop.permute.xlu0 %1663  ;;  %v1676_v6 = vmul.f32 %v3716_v39, %v1613_v14 }
 0x457   : > { %v1346_v57 = vadd.f32 %v1345_v36, %v1260_v0 }
 0x458   : > { %v2561_v37 = vpop.f32.mrf.mxu1  ;;  %v2603_v18 = vpop.f32.mrf.mxu0 }
 0x459   : > { %v1263_v50 = vmul.f32 %v2561_v37, %v1248_v32  ;;  %v1679_v37 = vmul.f32 %v2603_v18, %v1664_v25 }
 0x45a   : > { %v1207_v48 = vpop.f32.mrf.mxu1  ;;  %v1623_v35 = vpop.f32.mrf.mxu0 }
 0x45b   : > { %v1262_v44 = vmul.f32 %v1244_v42, %v1207_v48  ;;  %v1678_v42 = vmul.f32 %v1660_v3, %v1623_v35 }
 0x45c   : > { %v2564_v52 = vpop.f32.mrf.mxu1  ;;  %v2606_v62 = vpop.f32.mrf.mxu0 }
 0x45d   : > { %v1265_v36 = vmul.f32 %v2564_v52, %v1256_v24 }
 0x45e   : > { %v1217_v56 = vpop.f32.mrf.mxu1  ;;  %v1633_v52 = vpop.f32.mrf.mxu0 }
 0x45f   : > { %v1264_v48 = vmul.f32 %v3718_v47, %v1217_v56 }
 0x460   : > { %v2575_v58 = vpop.f32.mrf.mxu1 }
 0x462   : > { %v1355_v8 = vpop.f32.mrf.mxu1 }
 0x464   : > { %v2578_v9 = vpop.f32.mrf.mxu1 }
 0x466   : > { %v1365_v17 = vpop.f32.mrf.mxu1 }
 0x468   : > { %v2583_v40 = vpop.f32.mrf.mxu1 }
 0x469   : > { %v1517_v20 = vmul.f32 %v2583_v40, %v1490_v54  ;;  %v1356_v40 = vadd.f32 %v1355_v8, %v1262_v44  ;;  %v1366_v8 = vadd.f32 %v1365_v17, %v1264_v48  ;;  %v2368_v44 = vld [vmem:[%s3883_s6] ss:$0 sm:$0xff] }
 0x46a   : > { %v1445_v21 = vpop.f32.mrf.mxu1 }
 0x46b   : > { %v1525_v1 = vadd.f32 %v1517_v20, %v1341_v2  ;;  %v1516_v10 = vmul.f32 %v1486_v61, %v1445_v21  ;;  %v1672_v20 = vpop.permute.xlu1 %1671 }
 0x46c   : > { %v2586_v28 = vpop.f32.mrf.mxu1  ;;  %v1681_v56 = vmul.f32 %v2606_v62, %v1672_v20 }
 0x46d   : > { %v1683_v23 = vadd.f32 %v1675_v15, %v1525_v1  ;;  %v1524_v45 = vadd.f32 %v1516_v10, %v1336_v22  ;;  %v1519_v38 = vmul.f32 %v2586_v28, %v1498_v34  ;;  %v1361_v34 = vadd.f32 %v2575_v58, %v1263_v50 }
 0x46e   : > { %v1455_v51 = vpop.f32.mrf.mxu1 }
 0x46f   : > { %v1682_v16 = vadd.f32 %v1674_v13, %v1524_v45  ;;  %v1527_v61 = vadd.f32 %v1519_v38, %v1351_v63  ;;  %v1518_v26 = vmul.f32 %v3714_v33, %v1455_v51  ;;  %v1698_v55 = vadd.f32 %v3725_v41, %v1683_v23 }
 0x470   : > { %v2589_v54 = vpop.f32.mrf.mxu1 }
 0x471   : > { %v1685_v12 = vadd.f32 %v1677_v43, %v1527_v61  ;;  %v1526_v19 = vadd.f32 %v1518_v26, %v1346_v57  ;;  %v1521_v59 = vmul.f32 %v2589_v54, %v1506_v53  ;;  %v1697_v32 = vadd.f32 %v3725_v41, %v1682_v16  ;;  %v2860_v16 = vld [vmem:[%s3884_s7 + $0x10] sm:$0xff]   ;;  %v2861_v61 = vld [vmem:[%s3884_s7 + $0x8] sm:$0xff]  }
 0x472   : > { %v1465_v2 = vpop.f32.mrf.mxu1  ;;  %v1706_v4 = vmax.f32 %v1698_v55, 0.0  ;;  %v1371_v53 = vadd.f32 %v2578_v9, %v1265_v36  ;;  %v1680_v9 = vmul.f32 %v1668_v60, %v1633_v52  ;;  %2625 = vmatprep.subr.bf16.mxu0 %v2860_v16  ;;  %v3922_v52 = vld [vmem:[#allocation9_spill] sm:$0xff] }
 0x473   : > { %v1700_v38 = vadd.f32 %v3725_v41, %v1685_v12  ;;  %v1684_v63 = vadd.f32 %v1676_v6, %v1526_v19  ;;  %v1529_v33 = vadd.f32 %v1521_v59, %v1361_v34  ;;  %v1520_v39 = vmul.f32 %v1502_v7, %v1465_v2  ;;  %2626 = vmatpush3.bf16.msra.mxu0 %v2860_v16 }
 0x474   : > { %v2592_v58 = vpop.f32.mrf.mxu1  ;;  %v1705_v14 = vmax.f32 %v1697_v32, 0.0  ;;  %2627 = vmatprep.subr.bf16.mxu0 %v2861_v61  ;;  %1976 = vst.msk [vmem:[%s3245_s25 + $0x30] sm:$0xff] %vm1969_vm0, %v3922_v52 }
 0x475   : > { %v1699_v15 = vadd.f32 %v3725_v41, %v1684_v63  ;;  %v1687_v18 = vadd.f32 %v1679_v37, %v1529_v33  ;;  %v1528_v24 = vadd.f32 %v1520_v39, %v1356_v40  ;;  %v1708_v21 = vmax.f32 %v1700_v38, 0.0 }
 0x476   : > { %v1523_v22 = vmul.f32 %v2592_v58, %v1514_v5  ;;  %v1475_v0 = vpop.f32.mrf.mxu1  ;;  %v1713_v1 = vpack.c.bf16 %v1706_v4, %v1705_v14 }
 0x477   : > { %v1707_v10 = vmax.f32 %v1699_v15, 0.0  ;;  %v1686_v7 = vadd.f32 %v1678_v42, %v1528_v24  ;;  %v1522_v3 = vmul.f32 %v3720_v49, %v1475_v0  ;;  %v1702_v47 = vadd.f32 %v3725_v41, %v1687_v18  ;;  %2628 = vmatpush3.bf16.msra.mxu0 %v2861_v61 }
 0x478   : > { %v1531_v13 = vadd.f32 %v1523_v22, %v1371_v53  ;;  %2615 = vmatprep.mubr.msk.bf16.mxu1 %vm758_vm1, %v1713_v1 }
 0x479   : > { %v1714_v28 = vpack.c.bf16 %v1708_v21, %v1707_v10  ;;  %v1530_v23 = vadd.f32 %v1522_v3, %v1366_v8  ;;  %v1701_v45 = vadd.f32 %v3725_v41, %v1686_v7  ;;  %v1710_v50 = vmax.f32 %v1702_v47, 0.0  ;;  %v3923_v8 = vld [vmem:[#allocation10_spill] sm:$0xff]  ;;  %v2377_v21 = vld [vmem:[%s3885_s8] ss:$0 sm:$0xff] }
 0x47a   : > { %v1689_v17 = vadd.f32 %v1681_v56, %v1531_v13  ;;  %1977 = vst.msk [vmem:[%s3245_s25 + $0x38] sm:$0xff] %vm1969_vm0, %v3923_v8  ;;  %s2410_s25 = sshll.u32 %s3029_s20, 9 }
 0x47b   : > { %v1688_v43 = vadd.f32 %v1680_v9, %v1530_v23  ;;  %2616 = vmatmul.mubr.msk.bf16.vlgmr.msra.gmra.mxu1 %vm758_vm1, %v1714_v28  ;;  %v1709_v5 = vmax.f32 %v1701_v45, 0.0  ;;  %s3800_s23 = scalar_lea.hbm %s3887_s10, %s2410_s25  ;;  %s2869_s25 = scalar_lea.vmem %s2868_s26, 1024 }
 0x47c   : > { %v1704_v35 = vadd.f32 %v3725_v41, %v1689_v17  ;;  %p2871_p3 = scmp.lt.s32.totalorder %s2869_s25, %s2863_s24 }
 0x47d   : > { %v1715_v49 = vpack.c.bf16 %v1710_v50, %v1709_v5  ;;  %v1703_v51 = vadd.f32 %v3725_v41, %v1688_v43  ;;  %v2862_v41 = vld [vmem:[%s3884_s7] sm:$0xff]  }
 0x47e   : > { %v1712_v25 = vmax.f32 %v1704_v35, 0.0  ;;  %2629 = vmatprep.subr.bf16.mxu0 %v2862_v41  ;;  %p2872_p5 = por %p2871_p3, %p2870_p2 }
 0x47f   : > { %2619 = vmatprep.mubr.msk.bf16.mxu1 %vm758_vm1, %v1715_v49  ;;  %v1711_v57 = vmax.f32 %v1703_v51, 0.0  ;;  %2630 = vmatpush3.bf16.msra.mxu0 %v2862_v41 }
 0x480   : > { %p2873_p6 = pnand %p2872_p5, %p2866_p1 }
 0x481   : > { %v1716_v60 = vpack.c.bf16 %v1712_v25, %v1711_v57 }
 0x483   : > { %2620 = vmatmul.mubr.msk.bf16.gmra.mxu1 %vm758_vm1, %v1716_v60 }
 0x53b   : > { %v2617_v26 = vpop.f32.mrf.mxu1 }
 0x53c   : > { %v1811_v12 = vadd.f32 %v2617_v26, %v2368_v44 }
 0x53d   : > { %v1802_v6 = vpop.f32.mrf.mxu1 }
 0x53e   : > { %v1803_v54 = vadd.f32 %v2368_v44, %v1802_v6  ;;  %v1835_v40 = vmax.f32 %v1811_v12, 0.0 }
 0x53f   : > { %v2618_v34 = vpop.f32.mrf.mxu1 }
 0x540   : > { %v1814_v55 = vadd.f32 %v2618_v34, %v2368_v44  ;;  %v1833_v36 = vmax.f32 %v1803_v54, 0.0 }
 0x541   : > { %v1805_v19 = vpop.f32.mrf.mxu1 }
 0x542   : > { %v1806_v59 = vadd.f32 %v2368_v44, %v1805_v19  ;;  %v1836_v32 = vmax.f32 %v1814_v55, 0.0 }
 0x543   : > { %v2621_v37 = vpop.f32.mrf.mxu1 }
 0x544   : > { %v1834_v62 = vmax.f32 %v1806_v59, 0.0  ;;  %v1842_v63 = vpack.c.bf16 %v1836_v32, %v1835_v40  ;;  %v1827_v48 = vadd.f32 %v2621_v37, %v2368_v44 }
 0x545   : > { %v1818_v2 = vpop.f32.mrf.mxu1 }
 0x546   : > { %v1841_v38 = vpack.c.bf16 %v1834_v62, %v1833_v36  ;;  %v1819_v39 = vadd.f32 %v2368_v44, %v1818_v2  ;;  %v1839_v15 = vmax.f32 %v1827_v48, 0.0 }
 0x547   : > { %v2622_v33 = vpop.f32.mrf.mxu1 }
 0x548   : > { %v1830_v42 = vadd.f32 %v2622_v33, %v2368_v44  ;;  %2631 = vmatprep.mubr.msk.bf16.mxu0 %vm758_vm1, %v1841_v38  ;;  %v1837_v20 = vmax.f32 %v1819_v39, 0.0 }
 0x549   : > { %v1821_v58 = vpop.f32.mrf.mxu1  ;;  %2632 = vmatmul.mubr.msk.bf16.vlgmr.msra.gmra.mxu0 %vm758_vm1, %v1842_v63 }
 0x54a   : > { %v1822_v14 = vadd.f32 %v2368_v44, %v1821_v58  ;;  %v1840_v4 = vmax.f32 %v1830_v42, 0.0 }
 0x54c   : > { %v1838_v53 = vmax.f32 %v1822_v14, 0.0  ;;  %v1844_v24 = vpack.c.bf16 %v1840_v4, %v1839_v15 }
 0x54e   : > { %v1843_v18 = vpack.c.bf16 %v1838_v53, %v1837_v20 }
 0x550   : > { %2635 = vmatprep.mubr.msk.bf16.mxu0 %vm758_vm1, %v1843_v18 }
 0x551   : > { %2636 = vmatmul.mubr.msk.bf16.gmra.mxu0 %vm758_vm1, %v1844_v24 }
 0x609   : > { %v2633_v11 = vpop.f32.mrf.mxu0 }
 0x60a   : > { %v1939_v29 = vadd.f32 %v2633_v11, %v2377_v21 }
 0x60b   : > { %v1930_v22 = vpop.f32.mrf.mxu0 }
 0x60c   : > { %v1963_v27 = vmax.f32 %v1939_v29, 0.0  ;;  %v1931_v0 = vadd.f32 %v2377_v21, %v1930_v22 }
 0x60d   : > { %v2634_v30 = vpop.f32.mrf.mxu0 }
 0x60e   : > { %v2404_v31 = vpack.c.bf16 %v1963_v27, %v1963_v27  ;;  %v1961_v1 = vmax.f32 %v1931_v0, 0.0  ;;  %v1942_v46 = vadd.f32 %v2634_v30, %v2377_v21  ;;  %v2021_v34 = vsel %vm758_vm1, %v1963_v27, -inf }
 0x60f   : > { %v1933_v10 = vpop.f32.mrf.mxu0 }
 0x610   : > { %2013 = vst.msk [vmem:[%s3344_s14 + $0x8] sm:$0xf] %vm2010_vm14, %v2404_v31  ;;  %v2402_v7 = vpack.c.bf16 %v1961_v1, %v1961_v1  ;;  %v1964_v3 = vmax.f32 %v1942_v46, 0.0  ;;  %v1934_v47 = vadd.f32 %v2377_v21, %v1933_v10  ;;  %v2019_v55 = vsel %vm758_vm1, %v1961_v1, -inf }
 0x611   : > { %v2637_v56 = vpop.f32.mrf.mxu0 }
 0x612   : > { %2011 = vst.msk [vmem:[%s3344_s14] sm:$0xf] %vm2010_vm14, %v2402_v7  ;;  %v2405_v13 = vpack.c.bf16 %v1964_v3, %v1964_v3  ;;  %v1962_v9 = vmax.f32 %v1934_v47, 0.0  ;;  %v1955_v28 = vadd.f32 %v2637_v56, %v2377_v21  ;;  %v2022_v16 = vsel %vm758_vm1, %v1964_v3, -inf }
 0x613   : > { %v1946_v23 = vpop.f32.mrf.mxu0 }
 0x614   : > { %2014 = vst.msk [vmem:[%s3344_s14 + $0xc] sm:$0xf] %vm2010_vm14, %v2405_v13  ;;  %v2403_v45 = vpack.c.bf16 %v1962_v9, %v1962_v9  ;;  %v1967_v17 = vmax.f32 %v1955_v28, 0.0  ;;  %v1947_v43 = vadd.f32 %v2377_v21, %v1946_v23  ;;  %v2020_v12 = vsel %vm758_vm1, %v1962_v9, -inf }
 0x615   : > { %v2638_v5 = vpop.f32.mrf.mxu0 }
 0x616   : > { %2012 = vst.msk [vmem:[%s3344_s14 + $0x4] sm:$0xf] %vm2010_vm14, %v2403_v45  ;;  %v2408_v50 = vpack.c.bf16 %v1967_v17, %v1967_v17  ;;  %v1965_v35 = vmax.f32 %v1947_v43, 0.0  ;;  %v1958_v49 = vadd.f32 %v2638_v5, %v2377_v21  ;;  %v2027_v61 = vsel %vm758_vm1, %v1967_v17, -inf }
 0x617   : > { %v1949_v51 = vpop.f32.mrf.mxu0  ;;  %v2028_v32 = vmax.f32 %v2021_v34, %v2027_v61 }
 0x618   : > { %2017 = vst.msk [vmem:[%s3344_s14 + $0x18] sm:$0xf] %vm2010_vm14, %v2408_v50  ;;  %v2406_v57 = vpack.c.bf16 %v1965_v35, %v1965_v35  ;;  %v1968_v25 = vmax.f32 %v1958_v49, 0.0  ;;  %v1950_v60 = vadd.f32 %v2377_v21, %v1949_v51  ;;  %v2023_v41 = vsel %vm758_vm1, %v1965_v35, -inf }
 0x619   : > { %v2024_v37 = vmax.f32 %v2019_v55, %v2023_v41 }
 0x61a   : > { %2015 = vst.msk [vmem:[%s3344_s14 + $0x10] sm:$0xf] %vm2010_vm14, %v2406_v57  ;;  %v2409_v26 = vpack.c.bf16 %v1968_v25, %v1968_v25  ;;  %v2029_v6 = vsel %vm758_vm1, %v1968_v25, -inf  ;;  %v1966_v44 = vmax.f32 %v1950_v60, 0.0 }
 0x61b   : > { %v2030_v54 = vmax.f32 %v2022_v16, %v2029_v6 }
 0x61c   : > { %2018 = vst.msk [vmem:[%s3344_s14 + $0x1c] sm:$0xf] %vm2010_vm14, %v2409_v26  ;;  %v2407_v19 = vpack.c.bf16 %v1966_v44, %v1966_v44  ;;  %v2025_v59 = vsel %vm758_vm1, %v1966_v44, -inf }
 0x61d   : > { %v2026_v36 = vmax.f32 %v2020_v12, %v2025_v59  ;;  %v2032_v62 = vmax.f32 %v2028_v32, %v2030_v54 }
 0x61e   : > { %2016 = vst.msk [vmem:[%s3344_s14 + $0x14] sm:$0xf] %vm2010_vm14, %v2407_v19 }
 0x61f   : > { %v2031_v40 = vmax.f32 %v2024_v37, %v2026_v36 }
 0x620   : > { %2876 = shalt.err (!%p2873_p6)
}
 0x621   : > { %s2877_s14 = scalar_lea.hbm %s3800_s23, 512  ;;  %s2881_s13 = scalar_lea.hbm %s3887_s10, 1024 }
 0x622   : > { %p2878_p7 = scmp.ne.s32.totalorder %s3800_s23, %s2877_s14  ;;  %p2882_p11 = scmp.lt.s32.totalorder %s3800_s23, %s3887_s10 }
 0x623   : > { %p2883_p12 = scmp.lt.s32.totalorder %s2881_s13, %s2877_s14 }
 0x624   : > { %p2879_p9 = pnand %p2878_p7, %p3215_p4 }
 0x625   : > { %p2884_p13 = por %p2883_p12, %p2882_p11 }
 0x626   : > { %p2880_p10 = pneg %p2879_p9 }
 0x628   : > { %p2885_p0 = pnand %p2884_p13, %p2880_p10 }
 0x62a   : > { %2888 = shalt.err (!%p2885_p0)
}
 0x62b   : > { %s3112_s24 = smov 64   ;;  %s3113_s26 = smov 4   ;;  %v2033_v2 = vmax.f32 %v2031_v40, %v2032_v62  ;;  %vm2040_vm1 = vcmask 516096  }
 0x62c   : > { %s3924_s25 = scalar_lea.sflag [#allocation3], %s3231_s12  ;;  %s2397_s1 = sshll.u32 %s3029_s20, 4 }
 0x62d   : > { %2641 = dma.vmem_to_hbm [thread:$0]  (%p3215_p4), %s3802_s28, 512, %s3800_s23, %s3924_s25, %s3112_s24, %s3112_s24, %s3113_s26   ;;  %v2034_v38 = vrot.slane %v2033_v2, 4 }
 0x62e   : > { %s3925_s0 = scalar_lea.vmem [#allocation4], %s3231_s12  ;;  %s2091_s13 = scalar_lea.hbm %s3888_s11, %s2397_s1 }
 0x62f   : > { %v2035_v63 = vmax.f32 %v2033_v2, %v2034_v38  ;;  %s2093_s14 = sshll.u32 %s3925_s0, 4  ;;  %s3926_s2 = smov %s3925_s0  ;;  %s2094_s14 = int_to_ptr.vmem [resolvable:$true] %s2093_s14 }
 0x630   : > { %s2057_s28 = scalar_lea.sflag [#allocation5], %s3231_s12  ;;  %s2889_s23 = scalar_lea.vmem %s2094_s14, 16 }
 0x631   : > { %v2036_v33 = vrot.slane %v2035_v63, 2  ;;  %p2890_p1 = scmp.ne.s32.totalorder %s2094_s14, %s2889_s23  ;;  %s3114_s24 = smov [#allocation4]  }
 0x632   : > { %s2893_s20 = sshll.u32 %s3114_s24, 4  ;;  %s2894_s20 = int_to_ptr.vmem [resolvable:$false] %s2893_s20 }
 0x633   : > { %v2037_v39 = vmax.f32 %v2035_v63, %v2036_v33  ;;  %p2891_p2 = pnand %p2890_p1, %p3215_p4  ;;  %s2895_s26 = scalar_lea.vmem %s2894_s20, 32 }
 0x634   : > { %p2896_p5 = scmp.lt.s32.totalorder %s2094_s14, %s2894_s20  ;;  %p2897_p6 = scmp.lt.s32.totalorder %s2895_s26, %s2889_s23 }
 0x635   : > { %v2038_v42 = vrot.slane %v2037_v39, 1  ;;  %p2892_p3 = pneg %p2891_p2 }
 0x636   : > { %p2898_p7 = por %p2897_p6, %p2896_p5 }
 0x637   : > { %v2039_v48 = vmax.f32 %v2037_v39, %v2038_v42 }
 0x638   : > { %p2899_p9 = pnand %p2898_p7, %p2892_p3 }
 0x639   : > { %2041 = vst.msk [vmem:[%s3926_s2] sm:$0x1] %vm2040_vm1, %v2039_v48 }
 0x63a   : > { %2902 = shalt.err (!%p2899_p9)
}
 0x63b   : > { %s2903_s25 = scalar_lea.hbm %s2091_s13, 16  ;;  %s2907_s1 = scalar_lea.hbm %s3888_s11, 32 }
 0x63c   : > { %p2904_p10 = scmp.ne.s32.totalorder %s2091_s13, %s2903_s25  ;;  %p2908_p13 = scmp.lt.s32.totalorder %s2091_s13, %s3888_s11 }
 0x63d   : > { %p2909_p0 = scmp.lt.s32.totalorder %s2907_s1, %s2903_s25 }
 0x63e   : > { %p2905_p11 = pnand %p2904_p10, %p3215_p4 }
 0x63f   : > { %p2910_p1 = por %p2909_p0, %p2908_p13 }
 0x640   : > { %p2906_p12 = pneg %p2905_p11 }
 0x642   : > { %p2911_p2 = pnand %p2910_p1, %p2906_p12 }
 0x644   : > { %2914 = shalt.err (!%p2911_p2)
}
 0x645   : > { %2642 = dma.vmem_to_hbm [thread:$0]  (%p3215_p4), %s2094_s14, 16, %s2091_s13, %s2057_s28  }
 0x646 PF: > { %p2652_p3 = scmp.ge.s32.totalorder %s3037_s22, 2  ;;  %s2117_s16 = sand.u32 1, %s3017_s17  }
 0x647   : > { %s2118_s23 = scalar_lea.sflag [#allocation3], %s2117_s16 }
 0x648   : > { %p2646_p5 = pnand %p2652_p3, %p3222_p8 }
 0x64a   : > { %p2647_p6 = pneg %p2646_p5 }
 0x64c   : > { %3008 = dma.done.wait (%p2647_p6), %s2118_s23, 512  }
 0x64d   : > { %3010 = vsyncadd (%p2647_p6), %s2118_s23, 4294966784  ;;  %s2127_s24 = scalar_lea.sflag [#allocation5], %s2117_s16 }
 0x64e   : > { %3012 = dma.done.wait (%p2647_p6), %s2127_s24, 16  }
 0x64f   : > { %3014 = vsyncadd (%p2647_p6), %s2127_s24, 4294967280  ;;  %s28_s22 = sadd.s32 1, %s3037_s22   ;;  %s3927_s27 = sld [smem:[#allocation8_spill]] }
 0x650   : > { %p25_p7 = scmp.ge.s32.totalorder %s28_s22, 4   ;;  %s3928_s17 = smov %s3021_s18 }
 0x651   : > { %s3929_s18 = smov %s3025_s19  ;;  %s3930_s19 = smov %s3228_s30 }
 0x652   : > { %s3931_s20 = smov %s3033_s21  ;;  %27 = sbr.rel (!%p25_p7) target bundleno = 10 (0xa), region = 144 }
 0x655   : > { %s3932_s21 = smov %s3927_s27 }
 0x657   :  { %2131 = vsyncpa [#allocation3], 1 }
 0x658   :  { %2133 = vsyncpa [#allocation3 + $0x1], 1 }
 0x659   :  { %2134 = vsyncpa [#allocation5], 1 }
 0x65a   :  { %2136 = vsyncpa [#allocation5 + $0x1], 1 }

</bundles_post_ra>
